<compile_context>
chip_gen: v6e
topology: v6e:2x2x1
jax: 0.10.0
libtpu: 0.0.40
codegen_flags: <defaults>
</compile_context>

<pallas_src>
import functools

import jax
import jax.numpy as jnp
from jax import lax
from jax.experimental import pallas as pl
from jax.experimental.pallas import tpu as pltpu

D_MODEL = 32
D_FF = 4 * D_MODEL
N_HEADS = 4
EPS = 1e-5  # nn.LayerNorm default


# ---------------------------------------------------------------------------
# Fused kernel: one grid step = block_b batch elements, full decoder layer.
# ---------------------------------------------------------------------------
def _decoder_layer_kernel(x_ref, cr_ref,
                          wqkv_sa_ref, bqkv_sa_ref, wo_sa_ref, bo_sa_ref,
                          wqkv_ca_ref, bqkv_ca_ref, wo_ca_ref, bo_ca_ref,
                          w1_ref, b1_ref, w2_ref, b2_ref,
                          g_ref, beta_ref, o_ref,
                          *, n_heads, block_b, seq_q, seq_kv):
    x = x_ref[...]      # [block_b * L, D] f32
    cr = cr_ref[...]    # [block_b * S, D] f32

    def attention(xq, xkv, wqkv_ref, bqkv_ref, wo_ref, bo_ref, lq, lkv):
        # Head-split projections: clean [rows, D] x [D, dk] matmuls over the
        # whole slab -- no sub-128-lane slicing of Q/K/V in the kernel.
        q_h, k_h, v_h = [], [], []
        for h in range(n_heads):  # static unroll
            q_h.append(jnp.dot(xq, wqkv_ref[0, h],
                               preferred_element_type=jnp.float32)
                       + bqkv_ref[0, h])        # Wq/bq pre-scaled by 1/sqrt(dk)
            k_h.append(jnp.dot(xkv, wqkv_ref[1, h],
                               preferred_element_type=jnp.float32)
                       + bqkv_ref[1, h])
            v_h.append(jnp.dot(xkv, wqkv_ref[2, h],
                               preferred_element_type=jnp.float32)
                       + bqkv_ref[2, h])

        # Score / softmax / P@V per batch element (8-row aligned sublane slices).
        # TODO(synk): attn_mask support (x_mask / cross_mask are None here).
        # TODO(synk): for production L,S >= 512 switch to flash-style KV
        #             tiling with an online-softmax VMEM accumulator.
        rows = []
        for b in range(block_b):
            heads = []
            for h in range(n_heads):
                qb = q_h[h][b * lq:(b + 1) * lq]
                kb = k_h[h][b * lkv:(b + 1) * lkv]
                vb = v_h[h][b * lkv:(b + 1) * lkv]
                sc = lax.dot_general(qb, kb, (((1,), (1,)), ((), ())),
                                     preferred_element_type=jnp.float32)
                m = jnp.max(sc, axis=-1, keepdims=True)
                p = jnp.exp(sc - m)
                p = p / jnp.sum(p, axis=-1, keepdims=True)   # exact normalize
                heads.append(jnp.dot(p, vb,
                                     preferred_element_type=jnp.float32))
            rows.append(jnp.concatenate(heads, axis=-1))     # heads -> lanes
        o_all = rows[0] if block_b == 1 else jnp.concatenate(rows, axis=0)
        # Single output projection against the full Wo.
        return jnp.dot(o_all, wo_ref[...],
                       preferred_element_type=jnp.float32) + bo_ref[...]

    def add_ln(a, b, idx):
        t = a + b
        # E[x^2] - mu^2: both lane reductions issue back-to-back on the XLU.
        mu = jnp.mean(t, axis=-1, keepdims=True)
        msq = jnp.mean(t * t, axis=-1, keepdims=True)
        var = msq - mu * mu
        return (t - mu) * lax.rsqrt(var + EPS) * g_ref[idx] + beta_ref[idx]

    # x = norm1(x + self_attention(x, x, x))              (dropout = identity)
    a1 = attention(x, x, wqkv_sa_ref, bqkv_sa_ref, wo_sa_ref, bo_sa_ref,
                   seq_q, seq_q)
    x1 = add_ln(x, a1, 0)
    # x = norm2(x + cross_attention(x, cross, cross))
    a2 = attention(x1, cr, wqkv_ca_ref, bqkv_ca_ref, wo_ca_ref, bo_ca_ref,
                   seq_q, seq_kv)
    x2 = add_ln(x1, a2, 1)
    # y = conv2(relu(conv1(x)));  out = norm3(x + y)
    ff = jnp.maximum(jnp.dot(x2, w1_ref[...],
                             preferred_element_type=jnp.float32) + b1_ref[...],
                     0.0)
    y = jnp.dot(ff, w2_ref[...], preferred_element_type=jnp.float32) + b2_ref[...]
    # TODO(synk): if profiling shows a store tail, present a lane-dense
    #             (multiple-of-128) output slab instead of storing [rows, 32].
    o_ref[...] = add_ln(x2, y, 2).astype(o_ref.dtype)


# ---------------------------------------------------------------------------
# Host-side helpers
# ---------------------------------------------------------------------------
def _choose_block_b(batch):
    """Largest divisor of `batch` keeping >= 2 grid steps (v7x has 2 TCs)."""
    if batch <= 1:
        return 1
    for bb in range(batch // 2, 0, -1):
        if batch % bb == 0:
            return bb
    return 1


def _prep_attention_params(w4, b4, n_heads):
    """Canonical [4,D,D]/[4,1,D] (Wq,Wk,Wv,Wo as x @ W) -> head-split slabs.

    Folds the 1/sqrt(dk) attention scale into Wq and bq.
    Returns wqkv [3,H,D,dk], bqkv [3,H,1,dk], wo [D,D], bo [1,D].
    """
    d = w4.shape[-1]
    dk = d // n_heads
    scale = 1.0 / (dk ** 0.5)

    def split(w, b):
        ws = w.reshape(d, n_heads, dk).transpose(1, 0, 2)   # [H, D, dk]
        bs = b.reshape(1, n_heads, dk).transpose(1, 0, 2)   # [H, 1, dk]
        return ws, bs

    wq, bq = split(w4[0] * scale, b4[0] * scale)
    wk, bk = split(w4[1], b4[1])
    wv, bv = split(w4[2], b4[2])
    wqkv = jnp.stack([wq, wk, wv])    # [3, H, D, dk]
    bqkv = jnp.stack([bq, bk, bv])    # [3, H, 1, dk]
    return wqkv, bqkv, w4[3], b4[3]


# ---------------------------------------------------------------------------
# Wrapper: one pallas_call for the whole layer.
# ---------------------------------------------------------------------------
def decoder_layer_forward(x, cross, p, *, block_b=None):
    B, L, D = x.shape
    S = cross.shape[1]
    H = N_HEADS
    dk = D // H
    dff = p["w1"].shape[1]

    if block_b is None:
        block_b = _choose_block_b(B)
    if B % block_b != 0 or (block_b * L) % 8 != 0 or (block_b * S) % 8 != 0:
        block_b = B                    # fall back: one step, full-array block
    grid_b = B // block_b

    # Tiny host-side weight prep; fused / constant-folded by XLA under jit.
    # TODO(synk): cast weights + matmul activations to bf16 (f32 accumulate)
    #             for larger D on v6e/v7x; marginal at D=32 so kept f32 here.
    wqkv_sa, bqkv_sa, wo_sa, bo_sa = _prep_attention_params(
        p["self_w"], p["self_b"], H)
    wqkv_ca, bqkv_ca, wo_ca, bo_ca = _prep_attention_params(
        p["cross_w"], p["cross_b"], H)

    x2d = x.reshape(B * L, D)
    cr2d = cross.reshape(B * S, D)

    def attn_flops(lq, lkv):
        return (2 * lq * D * D          # Q proj
                + 2 * 2 * lkv * D * D   # K, V proj
                + 2 * 2 * lq * lkv * D  # scores + P@V (summed over heads)
                + 2 * lq * D * D)       # out proj
    flops = B * (attn_flops(L, L) + attn_flops(L, S) + 2 * 2 * L * D * dff)
    transcendentals = B * H * (L * L + L * S)
    bytes_accessed = 4 * (2 * x.size + cross.size
                          + sum(a.size for a in p.values()))

    const2 = lambda i: (0, 0)
    const3 = lambda i: (0, 0, 0)
    const4 = lambda i: (0, 0, 0, 0)

    kernel = functools.partial(_decoder_layer_kernel, n_heads=H,
                               block_b=block_b, seq_q=L, seq_kv=S)
    out2d = pl.pallas_call(
        kernel,
        out_shape=jax.ShapeDtypeStruct((B * L, D), x.dtype),
        grid=(grid_b,),
        in_specs=[
            pl.BlockSpec((block_b * L, D), lambda i: (i, 0)),   # x slab
            pl.BlockSpec((block_b * S, D), lambda i: (i, 0)),   # cross slab
            pl.BlockSpec((3, H, D, dk), const4),                # self-attn Wq/k/v
            pl.BlockSpec((3, H, 1, dk), const4),                # self-attn bq/k/v
            pl.BlockSpec((D, D), const2),                       # self-attn Wo
            pl.BlockSpec((1, D), const2),                       # self-attn bo
            pl.BlockSpec((3, H, D, dk), const4),                # cross-attn Wq/k/v
            pl.BlockSpec((3, H, 1, dk), const4),                # cross-attn bq/k/v
            pl.BlockSpec((D, D), const2),                       # cross-attn Wo
            pl.BlockSpec((1, D), const2),                       # cross-attn bo
            pl.BlockSpec((D, dff), const2),                     # conv1 W
            pl.BlockSpec((1, dff), const2),                     # conv1 b
            pl.BlockSpec((dff, D), const2),                     # conv2 W
            pl.BlockSpec((1, D), const2),                       # conv2 b
            pl.BlockSpec((3, 1, D), const3),                    # LN gammas
            pl.BlockSpec((3, 1, D), const3),                    # LN betas
        ],
        out_specs=pl.BlockSpec((block_b * L, D), lambda i: (i, 0)),
        compiler_params=pltpu.CompilerParams(
            dimension_semantics=("parallel",)),                 # 2x on v7x
        cost_estimate=pl.CostEstimate(flops=flops,
                                      transcendentals=transcendentals,
                                      bytes_accessed=bytes_accessed),
    )(x2d, cr2d,
      wqkv_sa, bqkv_sa, wo_sa, bo_sa,
      wqkv_ca, bqkv_ca, wo_ca, bo_ca,
      p["w1"], p["b1"], p["w2"], p["b2"],
      p["ln_g"], p["ln_b"])
    return out2d.reshape(B, L, D)


# ---------------------------------------------------------------------------
# Pure-JAX reference (numerical check for the fused kernel).
# ---------------------------------------------------------------------------
def reference_forward(x, cross, p):
    def attn(xq, xkv, w, b):
        q = xq @ w[0] + b[0]
        k = xkv @ w[1] + b[1]
        v = xkv @ w[2] + b[2]
        dk = q.shape[-1] // N_HEADS
        qh = q.reshape(q.shape[0], q.shape[1], N_HEADS, dk)
        kh = k.reshape(k.shape[0], k.shape[1], N_HEADS, dk)
        vh = v.reshape(v.shape[0], v.shape[1], N_HEADS, dk)
        s = jnp.einsum("blhd,bshd->bhls", qh, kh) / jnp.sqrt(dk)
        pr = jax.nn.softmax(s, axis=-1)
        o = jnp.einsum("bhls,bshd->blhd", pr, vh).reshape(q.shape)
        return o @ w[3] + b[3]

    def ln(s, g, bb):
        mu = s.mean(-1, keepdims=True)
        var = ((s - mu) ** 2).mean(-1, keepdims=True)
        return (s - mu) / jnp.sqrt(var + EPS) * g + bb

    x1 = ln(x + attn(x, x, p["self_w"], p["self_b"]), p["ln_g"][0], p["ln_b"][0])
    x2 = ln(x1 + attn(x1, cross, p["cross_w"], p["cross_b"]),
            p["ln_g"][1], p["ln_b"][1])
    h = jnp.maximum(x2 @ p["w1"] + p["b1"], 0.0)
    y = h @ p["w2"] + p["b2"]
    return ln(x2 + y, p["ln_g"][2], p["ln_b"][2])


# ---------------------------------------------------------------------------
# Deterministic parameter init (synthetic; no checkpoint load)
# ---------------------------------------------------------------------------
def init_params(key):
    def w(k, shape):
        return jax.random.normal(k, shape, jnp.float32) * 0.05

    ks = jax.random.split(key, 8)
    return dict(
        self_w=w(ks[0], (4, D_MODEL, D_MODEL)),     # (Wq, Wk, Wv, Wo), x @ W
        self_b=w(ks[1], (4, 1, D_MODEL)),
        cross_w=w(ks[2], (4, D_MODEL, D_MODEL)),
        cross_b=w(ks[3], (4, 1, D_MODEL)),
        w1=w(ks[4], (D_MODEL, D_FF)), b1=w(ks[5], (1, D_FF)),
        w2=w(ks[6], (D_FF, D_MODEL)), b2=w(ks[7], (1, D_MODEL)),
        ln_g=jnp.ones((3, 1, D_MODEL), jnp.float32),
        ln_b=jnp.zeros((3, 1, D_MODEL), jnp.float32),
    )


if __name__ == "__main__":
    key = jax.random.PRNGKey(0)
    k_x, k_c, k_p = jax.random.split(key, 3)
    B, L, S = 2, 8, 8
    x = jax.random.normal(k_x, (B, L, D_MODEL), jnp.float32)
    cross = jax.random.normal(k_c, (B, S, D_MODEL), jnp.float32)
    params = init_params(k_p)

    out = jax.jit(decoder_layer_forward)(x, cross, params)
    jax.block_until_ready(out)
    assert out.shape == (B, L, D_MODEL) and out.dtype == jnp.float32

    ref = reference_forward(x, cross, params)
    err = float(jnp.max(jnp.abs(out - ref)))
    assert jnp.allclose(out, ref, atol=1e-4, rtol=1e-4), f"max abs err {err}"
    print("KERNEL_OK")
</pallas_src>

<mosaic_0001>
module attributes {stable_mosaic.version = 11 : i64} {
  func.func @_decoder_layer_kernel(%arg0: i32, %arg1: memref<8x32xf32, #tpu.memory_space<vmem>>, %arg2: memref<8x32xf32, #tpu.memory_space<vmem>>, %arg3: memref<3x4x32x8xf32, #tpu.memory_space<vmem>>, %arg4: memref<3x4x1x8xf32, #tpu.memory_space<vmem>>, %arg5: memref<32x32xf32, #tpu.memory_space<vmem>>, %arg6: memref<1x32xf32, #tpu.memory_space<vmem>>, %arg7: memref<3x4x32x8xf32, #tpu.memory_space<vmem>>, %arg8: memref<3x4x1x8xf32, #tpu.memory_space<vmem>>, %arg9: memref<32x32xf32, #tpu.memory_space<vmem>>, %arg10: memref<1x32xf32, #tpu.memory_space<vmem>>, %arg11: memref<32x128xf32, #tpu.memory_space<vmem>>, %arg12: memref<1x128xf32, #tpu.memory_space<vmem>>, %arg13: memref<128x32xf32, #tpu.memory_space<vmem>>, %arg14: memref<1x32xf32, #tpu.memory_space<vmem>>, %arg15: memref<3x1x32xf32, #tpu.memory_space<vmem>>, %arg16: memref<3x1x32xf32, #tpu.memory_space<vmem>>, %arg17: memref<8x32xf32, #tpu.memory_space<vmem>>) attributes {dimension_semantics = [#tpu.dimension_semantics<parallel>], iteration_bounds = array<i64: 2>, scalar_prefetch = 0 : i64, scratch_operands = 0 : i64, tpu.core_type = #tpu.core_type<tc>, window_params = [{transform_indices = @transform_0, window_bounds = array<i64: 8, 32>}, {transform_indices = @transform_1, window_bounds = array<i64: 8, 32>}, {pipeline_mode = #tpu.pipeline_mode<synchronous>, transform_indices = @transform_2, window_bounds = array<i64: 3, 4, 32, 8>}, {pipeline_mode = #tpu.pipeline_mode<synchronous>, transform_indices = @transform_3, window_bounds = array<i64: 3, 4, 1, 8>}, {pipeline_mode = #tpu.pipeline_mode<synchronous>, transform_indices = @transform_4, window_bounds = array<i64: 32, 32>}, {pipeline_mode = #tpu.pipeline_mode<synchronous>, transform_indices = @transform_5, window_bounds = array<i64: 1, 32>}, {pipeline_mode = #tpu.pipeline_mode<synchronous>, transform_indices = @transform_6, window_bounds = array<i64: 3, 4, 32, 8>}, {pipeline_mode = #tpu.pipeline_mode<synchronous>, transform_indices = @transform_7, window_bounds = array<i64: 3, 4, 1, 8>}, {pipeline_mode = #tpu.pipeline_mode<synchronous>, transform_indices = @transform_8, window_bounds = array<i64: 32, 32>}, {pipeline_mode = #tpu.pipeline_mode<synchronous>, transform_indices = @transform_9, window_bounds = array<i64: 1, 32>}, {pipeline_mode = #tpu.pipeline_mode<synchronous>, transform_indices = @transform_10, window_bounds = array<i64: 32, 128>}, {pipeline_mode = #tpu.pipeline_mode<synchronous>, transform_indices = @transform_11, window_bounds = array<i64: 1, 128>}, {pipeline_mode = #tpu.pipeline_mode<synchronous>, transform_indices = @transform_12, window_bounds = array<i64: 128, 32>}, {pipeline_mode = #tpu.pipeline_mode<synchronous>, transform_indices = @transform_13, window_bounds = array<i64: 1, 32>}, {pipeline_mode = #tpu.pipeline_mode<synchronous>, transform_indices = @transform_14, window_bounds = array<i64: 3, 1, 32>}, {pipeline_mode = #tpu.pipeline_mode<synchronous>, transform_indices = @transform_15, window_bounds = array<i64: 3, 1, 32>}, {transform_indices = @transform_16, window_bounds = array<i64: 8, 32>}]} {
    %c0 = arith.constant 0 : index
    %c0_0 = arith.constant 0 : index
    %0 = vector.load %arg1[%c0, %c0_0] : memref<8x32xf32, #tpu.memory_space<vmem>>, vector<8x32xf32>
    %c0_1 = arith.constant 0 : index
    %c0_2 = arith.constant 0 : index
    %1 = vector.load %arg2[%c0_1, %c0_2] : memref<8x32xf32, #tpu.memory_space<vmem>>, vector<8x32xf32>
    %c0_3 = arith.constant 0 : index
    %c0_4 = arith.constant 0 : index
    %c0_5 = arith.constant 0 : index
    %c0_6 = arith.constant 0 : index
    %2 = vector.load %arg3[%c0_3, %c0_4, %c0_5, %c0_6] : memref<3x4x32x8xf32, #tpu.memory_space<vmem>>, vector<1x1x32x8xf32>
    %3 = vector.shape_cast %2 : vector<1x1x32x8xf32> to vector<32x8xf32>
    %cst = arith.constant dense<0.000000e+00> : vector<8x8xf32>
    %4 = tpu.matmul %0, %3, %cst {dimension_numbers = #tpu.dot_dimension_numbers<[1], [0], [0], [1], [0, 0, 1, 1], [], []>} : vector<8x32xf32>, vector<32x8xf32>, vector<8x8xf32> -> vector<8x8xf32>
    %c0_7 = arith.constant 0 : index
    %c0_8 = arith.constant 0 : index
    %c0_9 = arith.constant 0 : index
    %c0_10 = arith.constant 0 : index
    %5 = vector.load %arg4[%c0_7, %c0_8, %c0_9, %c0_10] : memref<3x4x1x8xf32, #tpu.memory_space<vmem>>, vector<1x1x1x8xf32>
    %6 = vector.shape_cast %5 : vector<1x1x1x8xf32> to vector<1x8xf32>
    %7 = vector.broadcast %6 : vector<1x8xf32> to vector<8x8xf32>
    %8 = arith.addf %4, %7 : vector<8x8xf32>
    %c1 = arith.constant 1 : index
    %c0_11 = arith.constant 0 : index
    %c0_12 = arith.constant 0 : index
    %c0_13 = arith.constant 0 : index
    %9 = vector.load %arg3[%c1, %c0_11, %c0_12, %c0_13] : memref<3x4x32x8xf32, #tpu.memory_space<vmem>>, vector<1x1x32x8xf32>
    %10 = vector.shape_cast %9 : vector<1x1x32x8xf32> to vector<32x8xf32>
    %cst_14 = arith.constant dense<0.000000e+00> : vector<8x8xf32>
    %11 = tpu.matmul %0, %10, %cst_14 {dimension_numbers = #tpu.dot_dimension_numbers<[1], [0], [0], [1], [0, 0, 1, 1], [], []>} : vector<8x32xf32>, vector<32x8xf32>, vector<8x8xf32> -> vector<8x8xf32>
    %c1_15 = arith.constant 1 : index
    %c0_16 = arith.constant 0 : index
    %c0_17 = arith.constant 0 : index
    %c0_18 = arith.constant 0 : index
    %12 = vector.load %arg4[%c1_15, %c0_16, %c0_17, %c0_18] : memref<3x4x1x8xf32, #tpu.memory_space<vmem>>, vector<1x1x1x8xf32>
    %13 = vector.shape_cast %12 : vector<1x1x1x8xf32> to vector<1x8xf32>
    %14 = vector.broadcast %13 : vector<1x8xf32> to vector<8x8xf32>
    %15 = arith.addf %11, %14 : vector<8x8xf32>
    %c2 = arith.constant 2 : index
    %c0_19 = arith.constant 0 : index
    %c0_20 = arith.constant 0 : index
    %c0_21 = arith.constant 0 : index
    %16 = vector.load %arg3[%c2, %c0_19, %c0_20, %c0_21] : memref<3x4x32x8xf32, #tpu.memory_space<vmem>>, vector<1x1x32x8xf32>
    %17 = vector.shape_cast %16 : vector<1x1x32x8xf32> to vector<32x8xf32>
    %cst_22 = arith.constant dense<0.000000e+00> : vector<8x8xf32>
    %18 = tpu.matmul %0, %17, %cst_22 {dimension_numbers = #tpu.dot_dimension_numbers<[1], [0], [0], [1], [0, 0, 1, 1], [], []>} : vector<8x32xf32>, vector<32x8xf32>, vector<8x8xf32> -> vector<8x8xf32>
    %c2_23 = arith.constant 2 : index
    %c0_24 = arith.constant 0 : index
    %c0_25 = arith.constant 0 : index
    %c0_26 = arith.constant 0 : index
    %19 = vector.load %arg4[%c2_23, %c0_24, %c0_25, %c0_26] : memref<3x4x1x8xf32, #tpu.memory_space<vmem>>, vector<1x1x1x8xf32>
    %20 = vector.shape_cast %19 : vector<1x1x1x8xf32> to vector<1x8xf32>
    %21 = vector.broadcast %20 : vector<1x8xf32> to vector<8x8xf32>
    %22 = arith.addf %18, %21 : vector<8x8xf32>
    %c0_27 = arith.constant 0 : index
    %c1_28 = arith.constant 1 : index
    %c0_29 = arith.constant 0 : index
    %c0_30 = arith.constant 0 : index
    %23 = vector.load %arg3[%c0_27, %c1_28, %c0_29, %c0_30] : memref<3x4x32x8xf32, #tpu.memory_space<vmem>>, vector<1x1x32x8xf32>
    %24 = vector.shape_cast %23 : vector<1x1x32x8xf32> to vector<32x8xf32>
    %cst_31 = arith.constant dense<0.000000e+00> : vector<8x8xf32>
    %25 = tpu.matmul %0, %24, %cst_31 {dimension_numbers = #tpu.dot_dimension_numbers<[1], [0], [0], [1], [0, 0, 1, 1], [], []>} : vector<8x32xf32>, vector<32x8xf32>, vector<8x8xf32> -> vector<8x8xf32>
    %c0_32 = arith.constant 0 : index
    %c1_33 = arith.constant 1 : index
    %c0_34 = arith.constant 0 : index
    %c0_35 = arith.constant 0 : index
    %26 = vector.load %arg4[%c0_32, %c1_33, %c0_34, %c0_35] : memref<3x4x1x8xf32, #tpu.memory_space<vmem>>, vector<1x1x1x8xf32>
    %27 = vector.shape_cast %26 : vector<1x1x1x8xf32> to vector<1x8xf32>
    %28 = vector.broadcast %27 : vector<1x8xf32> to vector<8x8xf32>
    %29 = arith.addf %25, %28 : vector<8x8xf32>
    %c1_36 = arith.constant 1 : index
    %c1_37 = arith.constant 1 : index
    %c0_38 = arith.constant 0 : index
    %c0_39 = arith.constant 0 : index
    %30 = vector.load %arg3[%c1_36, %c1_37, %c0_38, %c0_39] : memref<3x4x32x8xf32, #tpu.memory_space<vmem>>, vector<1x1x32x8xf32>
    %31 = vector.shape_cast %30 : vector<1x1x32x8xf32> to vector<32x8xf32>
    %cst_40 = arith.constant dense<0.000000e+00> : vector<8x8xf32>
    %32 = tpu.matmul %0, %31, %cst_40 {dimension_numbers = #tpu.dot_dimension_numbers<[1], [0], [0], [1], [0, 0, 1, 1], [], []>} : vector<8x32xf32>, vector<32x8xf32>, vector<8x8xf32> -> vector<8x8xf32>
    %c1_41 = arith.constant 1 : index
    %c1_42 = arith.constant 1 : index
    %c0_43 = arith.constant 0 : index
    %c0_44 = arith.constant 0 : index
    %33 = vector.load %arg4[%c1_41, %c1_42, %c0_43, %c0_44] : memref<3x4x1x8xf32, #tpu.memory_space<vmem>>, vector<1x1x1x8xf32>
    %34 = vector.shape_cast %33 : vector<1x1x1x8xf32> to vector<1x8xf32>
    %35 = vector.broadcast %34 : vector<1x8xf32> to vector<8x8xf32>
    %36 = arith.addf %32, %35 : vector<8x8xf32>
    %c2_45 = arith.constant 2 : index
    %c1_46 = arith.constant 1 : index
    %c0_47 = arith.constant 0 : index
    %c0_48 = arith.constant 0 : index
    %37 = vector.load %arg3[%c2_45, %c1_46, %c0_47, %c0_48] : memref<3x4x32x8xf32, #tpu.memory_space<vmem>>, vector<1x1x32x8xf32>
    %38 = vector.shape_cast %37 : vector<1x1x32x8xf32> to vector<32x8xf32>
    %cst_49 = arith.constant dense<0.000000e+00> : vector<8x8xf32>
    %39 = tpu.matmul %0, %38, %cst_49 {dimension_numbers = #tpu.dot_dimension_numbers<[1], [0], [0], [1], [0, 0, 1, 1], [], []>} : vector<8x32xf32>, vector<32x8xf32>, vector<8x8xf32> -> vector<8x8xf32>
    %c2_50 = arith.constant 2 : index
    %c1_51 = arith.constant 1 : index
    %c0_52 = arith.constant 0 : index
    %c0_53 = arith.constant 0 : index
    %40 = vector.load %arg4[%c2_50, %c1_51, %c0_52, %c0_53] : memref<3x4x1x8xf32, #tpu.memory_space<vmem>>, vector<1x1x1x8xf32>
    %41 = vector.shape_cast %40 : vector<1x1x1x8xf32> to vector<1x8xf32>
    %42 = vector.broadcast %41 : vector<1x8xf32> to vector<8x8xf32>
    %43 = arith.addf %39, %42 : vector<8x8xf32>
    %c0_54 = arith.constant 0 : index
    %c2_55 = arith.constant 2 : index
    %c0_56 = arith.constant 0 : index
    %c0_57 = arith.constant 0 : index
    %44 = vector.load %arg3[%c0_54, %c2_55, %c0_56, %c0_57] : memref<3x4x32x8xf32, #tpu.memory_space<vmem>>, vector<1x1x32x8xf32>
    %45 = vector.shape_cast %44 : vector<1x1x32x8xf32> to vector<32x8xf32>
    %cst_58 = arith.constant dense<0.000000e+00> : vector<8x8xf32>
    %46 = tpu.matmul %0, %45, %cst_58 {dimension_numbers = #tpu.dot_dimension_numbers<[1], [0], [0], [1], [0, 0, 1, 1], [], []>} : vector<8x32xf32>, vector<32x8xf32>, vector<8x8xf32> -> vector<8x8xf32>
    %c0_59 = arith.constant 0 : index
    %c2_60 = arith.constant 2 : index
    %c0_61 = arith.constant 0 : index
    %c0_62 = arith.constant 0 : index
    %47 = vector.load %arg4[%c0_59, %c2_60, %c0_61, %c0_62] : memref<3x4x1x8xf32, #tpu.memory_space<vmem>>, vector<1x1x1x8xf32>
    %48 = vector.shape_cast %47 : vector<1x1x1x8xf32> to vector<1x8xf32>
    %49 = vector.broadcast %48 : vector<1x8xf32> to vector<8x8xf32>
    %50 = arith.addf %46, %49 : vector<8x8xf32>
    %c1_63 = arith.constant 1 : index
    %c2_64 = arith.constant 2 : index
    %c0_65 = arith.constant 0 : index
    %c0_66 = arith.constant 0 : index
    %51 = vector.load %arg3[%c1_63, %c2_64, %c0_65, %c0_66] : memref<3x4x32x8xf32, #tpu.memory_space<vmem>>, vector<1x1x32x8xf32>
    %52 = vector.shape_cast %51 : vector<1x1x32x8xf32> to vector<32x8xf32>
    %cst_67 = arith.constant dense<0.000000e+00> : vector<8x8xf32>
    %53 = tpu.matmul %0, %52, %cst_67 {dimension_numbers = #tpu.dot_dimension_numbers<[1], [0], [0], [1], [0, 0, 1, 1], [], []>} : vector<8x32xf32>, vector<32x8xf32>, vector<8x8xf32> -> vector<8x8xf32>
    %c1_68 = arith.constant 1 : index
    %c2_69 = arith.constant 2 : index
    %c0_70 = arith.constant 0 : index
    %c0_71 = arith.constant 0 : index
    %54 = vector.load %arg4[%c1_68, %c2_69, %c0_70, %c0_71] : memref<3x4x1x8xf32, #tpu.memory_space<vmem>>, vector<1x1x1x8xf32>
    %55 = vector.shape_cast %54 : vector<1x1x1x8xf32> to vector<1x8xf32>
    %56 = vector.broadcast %55 : vector<1x8xf32> to vector<8x8xf32>
    %57 = arith.addf %53, %56 : vector<8x8xf32>
    %c2_72 = arith.constant 2 : index
    %c2_73 = arith.constant 2 : index
    %c0_74 = arith.constant 0 : index
    %c0_75 = arith.constant 0 : index
    %58 = vector.load %arg3[%c2_72, %c2_73, %c0_74, %c0_75] : memref<3x4x32x8xf32, #tpu.memory_space<vmem>>, vector<1x1x32x8xf32>
    %59 = vector.shape_cast %58 : vector<1x1x32x8xf32> to vector<32x8xf32>
    %cst_76 = arith.constant dense<0.000000e+00> : vector<8x8xf32>
    %60 = tpu.matmul %0, %59, %cst_76 {dimension_numbers = #tpu.dot_dimension_numbers<[1], [0], [0], [1], [0, 0, 1, 1], [], []>} : vector<8x32xf32>, vector<32x8xf32>, vector<8x8xf32> -> vector<8x8xf32>
    %c2_77 = arith.constant 2 : index
    %c2_78 = arith.constant 2 : index
    %c0_79 = arith.constant 0 : index
    %c0_80 = arith.constant 0 : index
    %61 = vector.load %arg4[%c2_77, %c2_78, %c0_79, %c0_80] : memref<3x4x1x8xf32, #tpu.memory_space<vmem>>, vector<1x1x1x8xf32>
    %62 = vector.shape_cast %61 : vector<1x1x1x8xf32> to vector<1x8xf32>
    %63 = vector.broadcast %62 : vector<1x8xf32> to vector<8x8xf32>
    %64 = arith.addf %60, %63 : vector<8x8xf32>
    %c0_81 = arith.constant 0 : index
    %c3 = arith.constant 3 : index
    %c0_82 = arith.constant 0 : index
    %c0_83 = arith.constant 0 : index
    %65 = vector.load %arg3[%c0_81, %c3, %c0_82, %c0_83] : memref<3x4x32x8xf32, #tpu.memory_space<vmem>>, vector<1x1x32x8xf32>
    %66 = vector.shape_cast %65 : vector<1x1x32x8xf32> to vector<32x8xf32>
    %cst_84 = arith.constant dense<0.000000e+00> : vector<8x8xf32>
    %67 = tpu.matmul %0, %66, %cst_84 {dimension_numbers = #tpu.dot_dimension_numbers<[1], [0], [0], [1], [0, 0, 1, 1], [], []>} : vector<8x32xf32>, vector<32x8xf32>, vector<8x8xf32> -> vector<8x8xf32>
    %c0_85 = arith.constant 0 : index
    %c3_86 = arith.constant 3 : index
    %c0_87 = arith.constant 0 : index
    %c0_88 = arith.constant 0 : index
    %68 = vector.load %arg4[%c0_85, %c3_86, %c0_87, %c0_88] : memref<3x4x1x8xf32, #tpu.memory_space<vmem>>, vector<1x1x1x8xf32>
    %69 = vector.shape_cast %68 : vector<1x1x1x8xf32> to vector<1x8xf32>
    %70 = vector.broadcast %69 : vector<1x8xf32> to vector<8x8xf32>
    %71 = arith.addf %67, %70 : vector<8x8xf32>
    %c1_89 = arith.constant 1 : index
    %c3_90 = arith.constant 3 : index
    %c0_91 = arith.constant 0 : index
    %c0_92 = arith.constant 0 : index
    %72 = vector.load %arg3[%c1_89, %c3_90, %c0_91, %c0_92] : memref<3x4x32x8xf32, #tpu.memory_space<vmem>>, vector<1x1x32x8xf32>
    %73 = vector.shape_cast %72 : vector<1x1x32x8xf32> to vector<32x8xf32>
    %cst_93 = arith.constant dense<0.000000e+00> : vector<8x8xf32>
    %74 = tpu.matmul %0, %73, %cst_93 {dimension_numbers = #tpu.dot_dimension_numbers<[1], [0], [0], [1], [0, 0, 1, 1], [], []>} : vector<8x32xf32>, vector<32x8xf32>, vector<8x8xf32> -> vector<8x8xf32>
    %c1_94 = arith.constant 1 : index
    %c3_95 = arith.constant 3 : index
    %c0_96 = arith.constant 0 : index
    %c0_97 = arith.constant 0 : index
    %75 = vector.load %arg4[%c1_94, %c3_95, %c0_96, %c0_97] : memref<3x4x1x8xf32, #tpu.memory_space<vmem>>, vector<1x1x1x8xf32>
    %76 = vector.shape_cast %75 : vector<1x1x1x8xf32> to vector<1x8xf32>
    %77 = vector.broadcast %76 : vector<1x8xf32> to vector<8x8xf32>
    %78 = arith.addf %74, %77 : vector<8x8xf32>
    %c2_98 = arith.constant 2 : index
    %c3_99 = arith.constant 3 : index
    %c0_100 = arith.constant 0 : index
    %c0_101 = arith.constant 0 : index
    %79 = vector.load %arg3[%c2_98, %c3_99, %c0_100, %c0_101] : memref<3x4x32x8xf32, #tpu.memory_space<vmem>>, vector<1x1x32x8xf32>
    %80 = vector.shape_cast %79 : vector<1x1x32x8xf32> to vector<32x8xf32>
    %cst_102 = arith.constant dense<0.000000e+00> : vector<8x8xf32>
    %81 = tpu.matmul %0, %80, %cst_102 {dimension_numbers = #tpu.dot_dimension_numbers<[1], [0], [0], [1], [0, 0, 1, 1], [], []>} : vector<8x32xf32>, vector<32x8xf32>, vector<8x8xf32> -> vector<8x8xf32>
    %c2_103 = arith.constant 2 : index
    %c3_104 = arith.constant 3 : index
    %c0_105 = arith.constant 0 : index
    %c0_106 = arith.constant 0 : index
    %82 = vector.load %arg4[%c2_103, %c3_104, %c0_105, %c0_106] : memref<3x4x1x8xf32, #tpu.memory_space<vmem>>, vector<1x1x1x8xf32>
    %83 = vector.shape_cast %82 : vector<1x1x1x8xf32> to vector<1x8xf32>
    %84 = vector.broadcast %83 : vector<1x8xf32> to vector<8x8xf32>
    %85 = arith.addf %81, %84 : vector<8x8xf32>
    %cst_107 = arith.constant dense<0.000000e+00> : vector<8x8xf32>
    %86 = tpu.matmul %8, %15, %cst_107 {dimension_numbers = #tpu.dot_dimension_numbers<[1], [1], [0], [0], [0, 0, 1, 0], [], []>} : vector<8x8xf32>, vector<8x8xf32>, vector<8x8xf32> -> vector<8x8xf32>
    %cst_108 = arith.constant dense<0xFF800000> : vector<8xf32>
    %87 = vector.multi_reduction <maximumf>, %86, %cst_108 [1] : vector<8x8xf32> to vector<8xf32>
    %88 = vector.shape_cast %87 : vector<8xf32> to vector<8x1xf32>
    %89 = vector.broadcast %88 : vector<8x1xf32> to vector<8x8xf32>
    %90 = arith.subf %86, %89 : vector<8x8xf32>
    %91 = math.exp %90 : vector<8x8xf32>
    %cst_109 = arith.constant dense<0.000000e+00> : vector<8xf32>
    %92 = vector.multi_reduction <add>, %91, %cst_109 [1] : vector<8x8xf32> to vector<8xf32>
    %93 = vector.shape_cast %92 : vector<8xf32> to vector<8x1xf32>
    %94 = vector.broadcast %93 : vector<8x1xf32> to vector<8x8xf32>
    %95 = arith.divf %91, %94 : vector<8x8xf32>
    %cst_110 = arith.constant dense<0.000000e+00> : vector<8x8xf32>
    %96 = tpu.matmul %95, %22, %cst_110 {dimension_numbers = #tpu.dot_dimension_numbers<[1], [0], [0], [1], [0, 0, 1, 1], [], []>} : vector<8x8xf32>, vector<8x8xf32>, vector<8x8xf32> -> vector<8x8xf32>
    %cst_111 = arith.constant dense<0.000000e+00> : vector<8x8xf32>
    %97 = tpu.matmul %29, %36, %cst_111 {dimension_numbers = #tpu.dot_dimension_numbers<[1], [1], [0], [0], [0, 0, 1, 0], [], []>} : vector<8x8xf32>, vector<8x8xf32>, vector<8x8xf32> -> vector<8x8xf32>
    %cst_112 = arith.constant dense<0xFF800000> : vector<8xf32>
    %98 = vector.multi_reduction <maximumf>, %97, %cst_112 [1] : vector<8x8xf32> to vector<8xf32>
    %99 = vector.shape_cast %98 : vector<8xf32> to vector<8x1xf32>
    %100 = vector.broadcast %99 : vector<8x1xf32> to vector<8x8xf32>
    %101 = arith.subf %97, %100 : vector<8x8xf32>
    %102 = math.exp %101 : vector<8x8xf32>
    %cst_113 = arith.constant dense<0.000000e+00> : vector<8xf32>
    %103 = vector.multi_reduction <add>, %102, %cst_113 [1] : vector<8x8xf32> to vector<8xf32>
    %104 = vector.shape_cast %103 : vector<8xf32> to vector<8x1xf32>
    %105 = vector.broadcast %104 : vector<8x1xf32> to vector<8x8xf32>
    %106 = arith.divf %102, %105 : vector<8x8xf32>
    %cst_114 = arith.constant dense<0.000000e+00> : vector<8x8xf32>
    %107 = tpu.matmul %106, %43, %cst_114 {dimension_numbers = #tpu.dot_dimension_numbers<[1], [0], [0], [1], [0, 0, 1, 1], [], []>} : vector<8x8xf32>, vector<8x8xf32>, vector<8x8xf32> -> vector<8x8xf32>
    %cst_115 = arith.constant dense<0.000000e+00> : vector<8x8xf32>
    %108 = tpu.matmul %50, %57, %cst_115 {dimension_numbers = #tpu.dot_dimension_numbers<[1], [1], [0], [0], [0, 0, 1, 0], [], []>} : vector<8x8xf32>, vector<8x8xf32>, vector<8x8xf32> -> vector<8x8xf32>
    %cst_116 = arith.constant dense<0xFF800000> : vector<8xf32>
    %109 = vector.multi_reduction <maximumf>, %108, %cst_116 [1] : vector<8x8xf32> to vector<8xf32>
    %110 = vector.shape_cast %109 : vector<8xf32> to vector<8x1xf32>
    %111 = vector.broadcast %110 : vector<8x1xf32> to vector<8x8xf32>
    %112 = arith.subf %108, %111 : vector<8x8xf32>
    %113 = math.exp %112 : vector<8x8xf32>
    %cst_117 = arith.constant dense<0.000000e+00> : vector<8xf32>
    %114 = vector.multi_reduction <add>, %113, %cst_117 [1] : vector<8x8xf32> to vector<8xf32>
    %115 = vector.shape_cast %114 : vector<8xf32> to vector<8x1xf32>
    %116 = vector.broadcast %115 : vector<8x1xf32> to vector<8x8xf32>
    %117 = arith.divf %113, %116 : vector<8x8xf32>
    %cst_118 = arith.constant dense<0.000000e+00> : vector<8x8xf32>
    %118 = tpu.matmul %117, %64, %cst_118 {dimension_numbers = #tpu.dot_dimension_numbers<[1], [0], [0], [1], [0, 0, 1, 1], [], []>} : vector<8x8xf32>, vector<8x8xf32>, vector<8x8xf32> -> vector<8x8xf32>
    %cst_119 = arith.constant dense<0.000000e+00> : vector<8x8xf32>
    %119 = tpu.matmul %71, %78, %cst_119 {dimension_numbers = #tpu.dot_dimension_numbers<[1], [1], [0], [0], [0, 0, 1, 0], [], []>} : vector<8x8xf32>, vector<8x8xf32>, vector<8x8xf32> -> vector<8x8xf32>
    %cst_120 = arith.constant dense<0xFF800000> : vector<8xf32>
    %120 = vector.multi_reduction <maximumf>, %119, %cst_120 [1] : vector<8x8xf32> to vector<8xf32>
    %121 = vector.shape_cast %120 : vector<8xf32> to vector<8x1xf32>
    %122 = vector.broadcast %121 : vector<8x1xf32> to vector<8x8xf32>
    %123 = arith.subf %119, %122 : vector<8x8xf32>
    %124 = math.exp %123 : vector<8x8xf32>
    %cst_121 = arith.constant dense<0.000000e+00> : vector<8xf32>
    %125 = vector.multi_reduction <add>, %124, %cst_121 [1] : vector<8x8xf32> to vector<8xf32>
    %126 = vector.shape_cast %125 : vector<8xf32> to vector<8x1xf32>
    %127 = vector.broadcast %126 : vector<8x1xf32> to vector<8x8xf32>
    %128 = arith.divf %124, %127 : vector<8x8xf32>
    %cst_122 = arith.constant dense<0.000000e+00> : vector<8x8xf32>
    %129 = tpu.matmul %128, %85, %cst_122 {dimension_numbers = #tpu.dot_dimension_numbers<[1], [0], [0], [1], [0, 0, 1, 1], [], []>} : vector<8x8xf32>, vector<8x8xf32>, vector<8x8xf32> -> vector<8x8xf32>
    %130 = tpu.concatenate %96, %107, %118, %129 in 1 : vector<8x8xf32>, vector<8x8xf32>, vector<8x8xf32>, vector<8x8xf32> -> vector<8x32xf32>
    %c0_123 = arith.constant 0 : index
    %c0_124 = arith.constant 0 : index
    %131 = vector.load %arg5[%c0_123, %c0_124] : memref<32x32xf32, #tpu.memory_space<vmem>>, vector<32x32xf32>
    %cst_125 = arith.constant dense<0.000000e+00> : vector<8x32xf32>
    %132 = tpu.matmul %130, %131, %cst_125 {dimension_numbers = #tpu.dot_dimension_numbers<[1], [0], [0], [1], [0, 0, 1, 1], [], []>} : vector<8x32xf32>, vector<32x32xf32>, vector<8x32xf32> -> vector<8x32xf32>
    %c0_126 = arith.constant 0 : index
    %c0_127 = arith.constant 0 : index
    %133 = vector.load %arg6[%c0_126, %c0_127] : memref<1x32xf32, #tpu.memory_space<vmem>>, vector<1x32xf32>
    %134 = vector.broadcast %133 : vector<1x32xf32> to vector<8x32xf32>
    %135 = arith.addf %132, %134 : vector<8x32xf32>
    %136 = arith.addf %0, %135 : vector<8x32xf32>
    %cst_128 = arith.constant dense<0.000000e+00> : vector<8xf32>
    %137 = vector.multi_reduction <add>, %136, %cst_128 [1] : vector<8x32xf32> to vector<8xf32>
    %138 = vector.shape_cast %137 : vector<8xf32> to vector<8x1xf32>
    %cst_129 = arith.constant 3.200000e+01 : f32
    %139 = vector.broadcast %cst_129 : f32 to vector<8x1xf32>
    %140 = arith.divf %138, %139 : vector<8x1xf32>
    %141 = arith.mulf %136, %136 : vector<8x32xf32>
    %cst_130 = arith.constant dense<0.000000e+00> : vector<8xf32>
    %142 = vector.multi_reduction <add>, %141, %cst_130 [1] : vector<8x32xf32> to vector<8xf32>
    %143 = vector.shape_cast %142 : vector<8xf32> to vector<8x1xf32>
    %cst_131 = arith.constant 3.200000e+01 : f32
    %144 = vector.broadcast %cst_131 : f32 to vector<8x1xf32>
    %145 = arith.divf %143, %144 : vector<8x1xf32>
    %146 = arith.mulf %140, %140 : vector<8x1xf32>
    %147 = arith.subf %145, %146 : vector<8x1xf32>
    %148 = vector.broadcast %140 : vector<8x1xf32> to vector<8x32xf32>
    %149 = arith.subf %136, %148 : vector<8x32xf32>
    %cst_132 = arith.constant 9.99999974E-6 : f32
    %150 = vector.broadcast %cst_132 : f32 to vector<8x1xf32>
    %151 = arith.addf %147, %150 : vector<8x1xf32>
    %152 = math.rsqrt %151 : vector<8x1xf32>
    %153 = vector.broadcast %152 : vector<8x1xf32> to vector<8x32xf32>
    %154 = arith.mulf %149, %153 : vector<8x32xf32>
    %c0_133 = arith.constant 0 : index
    %c0_134 = arith.constant 0 : index
    %c0_135 = arith.constant 0 : index
    %155 = vector.load %arg15[%c0_133, %c0_134, %c0_135] : memref<3x1x32xf32, #tpu.memory_space<vmem>>, vector<1x1x32xf32>
    %156 = vector.shape_cast %155 : vector<1x1x32xf32> to vector<1x32xf32>
    %157 = vector.broadcast %156 : vector<1x32xf32> to vector<8x32xf32>
    %158 = arith.mulf %154, %157 : vector<8x32xf32>
    %c0_136 = arith.constant 0 : index
    %c0_137 = arith.constant 0 : index
    %c0_138 = arith.constant 0 : index
    %159 = vector.load %arg16[%c0_136, %c0_137, %c0_138] : memref<3x1x32xf32, #tpu.memory_space<vmem>>, vector<1x1x32xf32>
    %160 = vector.shape_cast %159 : vector<1x1x32xf32> to vector<1x32xf32>
    %161 = vector.broadcast %160 : vector<1x32xf32> to vector<8x32xf32>
    %162 = arith.addf %158, %161 : vector<8x32xf32>
    %c0_139 = arith.constant 0 : index
    %c0_140 = arith.constant 0 : index
    %c0_141 = arith.constant 0 : index
    %c0_142 = arith.constant 0 : index
    %163 = vector.load %arg7[%c0_139, %c0_140, %c0_141, %c0_142] : memref<3x4x32x8xf32, #tpu.memory_space<vmem>>, vector<1x1x32x8xf32>
    %164 = vector.shape_cast %163 : vector<1x1x32x8xf32> to vector<32x8xf32>
    %cst_143 = arith.constant dense<0.000000e+00> : vector<8x8xf32>
    %165 = tpu.matmul %162, %164, %cst_143 {dimension_numbers = #tpu.dot_dimension_numbers<[1], [0], [0], [1], [0, 0, 1, 1], [], []>} : vector<8x32xf32>, vector<32x8xf32>, vector<8x8xf32> -> vector<8x8xf32>
    %c0_144 = arith.constant 0 : index
    %c0_145 = arith.constant 0 : index
    %c0_146 = arith.constant 0 : index
    %c0_147 = arith.constant 0 : index
    %166 = vector.load %arg8[%c0_144, %c0_145, %c0_146, %c0_147] : memref<3x4x1x8xf32, #tpu.memory_space<vmem>>, vector<1x1x1x8xf32>
    %167 = vector.shape_cast %166 : vector<1x1x1x8xf32> to vector<1x8xf32>
    %168 = vector.broadcast %167 : vector<1x8xf32> to vector<8x8xf32>
    %169 = arith.addf %165, %168 : vector<8x8xf32>
    %c1_148 = arith.constant 1 : index
    %c0_149 = arith.constant 0 : index
    %c0_150 = arith.constant 0 : index
    %c0_151 = arith.constant 0 : index
    %170 = vector.load %arg7[%c1_148, %c0_149, %c0_150, %c0_151] : memref<3x4x32x8xf32, #tpu.memory_space<vmem>>, vector<1x1x32x8xf32>
    %171 = vector.shape_cast %170 : vector<1x1x32x8xf32> to vector<32x8xf32>
    %cst_152 = arith.constant dense<0.000000e+00> : vector<8x8xf32>
    %172 = tpu.matmul %1, %171, %cst_152 {dimension_numbers = #tpu.dot_dimension_numbers<[1], [0], [0], [1], [0, 0, 1, 1], [], []>} : vector<8x32xf32>, vector<32x8xf32>, vector<8x8xf32> -> vector<8x8xf32>
    %c1_153 = arith.constant 1 : index
    %c0_154 = arith.constant 0 : index
    %c0_155 = arith.constant 0 : index
    %c0_156 = arith.constant 0 : index
    %173 = vector.load %arg8[%c1_153, %c0_154, %c0_155, %c0_156] : memref<3x4x1x8xf32, #tpu.memory_space<vmem>>, vector<1x1x1x8xf32>
    %174 = vector.shape_cast %173 : vector<1x1x1x8xf32> to vector<1x8xf32>
    %175 = vector.broadcast %174 : vector<1x8xf32> to vector<8x8xf32>
    %176 = arith.addf %172, %175 : vector<8x8xf32>
    %c2_157 = arith.constant 2 : index
    %c0_158 = arith.constant 0 : index
    %c0_159 = arith.constant 0 : index
    %c0_160 = arith.constant 0 : index
    %177 = vector.load %arg7[%c2_157, %c0_158, %c0_159, %c0_160] : memref<3x4x32x8xf32, #tpu.memory_space<vmem>>, vector<1x1x32x8xf32>
    %178 = vector.shape_cast %177 : vector<1x1x32x8xf32> to vector<32x8xf32>
    %cst_161 = arith.constant dense<0.000000e+00> : vector<8x8xf32>
    %179 = tpu.matmul %1, %178, %cst_161 {dimension_numbers = #tpu.dot_dimension_numbers<[1], [0], [0], [1], [0, 0, 1, 1], [], []>} : vector<8x32xf32>, vector<32x8xf32>, vector<8x8xf32> -> vector<8x8xf32>
    %c2_162 = arith.constant 2 : index
    %c0_163 = arith.constant 0 : index
    %c0_164 = arith.constant 0 : index
    %c0_165 = arith.constant 0 : index
    %180 = vector.load %arg8[%c2_162, %c0_163, %c0_164, %c0_165] : memref<3x4x1x8xf32, #tpu.memory_space<vmem>>, vector<1x1x1x8xf32>
    %181 = vector.shape_cast %180 : vector<1x1x1x8xf32> to vector<1x8xf32>
    %182 = vector.broadcast %181 : vector<1x8xf32> to vector<8x8xf32>
    %183 = arith.addf %179, %182 : vector<8x8xf32>
    %c0_166 = arith.constant 0 : index
    %c1_167 = arith.constant 1 : index
    %c0_168 = arith.constant 0 : index
    %c0_169 = arith.constant 0 : index
    %184 = vector.load %arg7[%c0_166, %c1_167, %c0_168, %c0_169] : memref<3x4x32x8xf32, #tpu.memory_space<vmem>>, vector<1x1x32x8xf32>
    %185 = vector.shape_cast %184 : vector<1x1x32x8xf32> to vector<32x8xf32>
    %cst_170 = arith.constant dense<0.000000e+00> : vector<8x8xf32>
    %186 = tpu.matmul %162, %185, %cst_170 {dimension_numbers = #tpu.dot_dimension_numbers<[1], [0], [0], [1], [0, 0, 1, 1], [], []>} : vector<8x32xf32>, vector<32x8xf32>, vector<8x8xf32> -> vector<8x8xf32>
    %c0_171 = arith.constant 0 : index
    %c1_172 = arith.constant 1 : index
    %c0_173 = arith.constant 0 : index
    %c0_174 = arith.constant 0 : index
    %187 = vector.load %arg8[%c0_171, %c1_172, %c0_173, %c0_174] : memref<3x4x1x8xf32, #tpu.memory_space<vmem>>, vector<1x1x1x8xf32>
    %188 = vector.shape_cast %187 : vector<1x1x1x8xf32> to vector<1x8xf32>
    %189 = vector.broadcast %188 : vector<1x8xf32> to vector<8x8xf32>
    %190 = arith.addf %186, %189 : vector<8x8xf32>
    %c1_175 = arith.constant 1 : index
    %c1_176 = arith.constant 1 : index
    %c0_177 = arith.constant 0 : index
    %c0_178 = arith.constant 0 : index
    %191 = vector.load %arg7[%c1_175, %c1_176, %c0_177, %c0_178] : memref<3x4x32x8xf32, #tpu.memory_space<vmem>>, vector<1x1x32x8xf32>
    %192 = vector.shape_cast %191 : vector<1x1x32x8xf32> to vector<32x8xf32>
    %cst_179 = arith.constant dense<0.000000e+00> : vector<8x8xf32>
    %193 = tpu.matmul %1, %192, %cst_179 {dimension_numbers = #tpu.dot_dimension_numbers<[1], [0], [0], [1], [0, 0, 1, 1], [], []>} : vector<8x32xf32>, vector<32x8xf32>, vector<8x8xf32> -> vector<8x8xf32>
    %c1_180 = arith.constant 1 : index
    %c1_181 = arith.constant 1 : index
    %c0_182 = arith.constant 0 : index
    %c0_183 = arith.constant 0 : index
    %194 = vector.load %arg8[%c1_180, %c1_181, %c0_182, %c0_183] : memref<3x4x1x8xf32, #tpu.memory_space<vmem>>, vector<1x1x1x8xf32>
    %195 = vector.shape_cast %194 : vector<1x1x1x8xf32> to vector<1x8xf32>
    %196 = vector.broadcast %195 : vector<1x8xf32> to vector<8x8xf32>
    %197 = arith.addf %193, %196 : vector<8x8xf32>
    %c2_184 = arith.constant 2 : index
    %c1_185 = arith.constant 1 : index
    %c0_186 = arith.constant 0 : index
    %c0_187 = arith.constant 0 : index
    %198 = vector.load %arg7[%c2_184, %c1_185, %c0_186, %c0_187] : memref<3x4x32x8xf32, #tpu.memory_space<vmem>>, vector<1x1x32x8xf32>
    %199 = vector.shape_cast %198 : vector<1x1x32x8xf32> to vector<32x8xf32>
    %cst_188 = arith.constant dense<0.000000e+00> : vector<8x8xf32>
    %200 = tpu.matmul %1, %199, %cst_188 {dimension_numbers = #tpu.dot_dimension_numbers<[1], [0], [0], [1], [0, 0, 1, 1], [], []>} : vector<8x32xf32>, vector<32x8xf32>, vector<8x8xf32> -> vector<8x8xf32>
    %c2_189 = arith.constant 2 : index
    %c1_190 = arith.constant 1 : index
    %c0_191 = arith.constant 0 : index
    %c0_192 = arith.constant 0 : index
    %201 = vector.load %arg8[%c2_189, %c1_190, %c0_191, %c0_192] : memref<3x4x1x8xf32, #tpu.memory_space<vmem>>, vector<1x1x1x8xf32>
    %202 = vector.shape_cast %201 : vector<1x1x1x8xf32> to vector<1x8xf32>
    %203 = vector.broadcast %202 : vector<1x8xf32> to vector<8x8xf32>
    %204 = arith.addf %200, %203 : vector<8x8xf32>
    %c0_193 = arith.constant 0 : index
    %c2_194 = arith.constant 2 : index
    %c0_195 = arith.constant 0 : index
    %c0_196 = arith.constant 0 : index
    %205 = vector.load %arg7[%c0_193, %c2_194, %c0_195, %c0_196] : memref<3x4x32x8xf32, #tpu.memory_space<vmem>>, vector<1x1x32x8xf32>
    %206 = vector.shape_cast %205 : vector<1x1x32x8xf32> to vector<32x8xf32>
    %cst_197 = arith.constant dense<0.000000e+00> : vector<8x8xf32>
    %207 = tpu.matmul %162, %206, %cst_197 {dimension_numbers = #tpu.dot_dimension_numbers<[1], [0], [0], [1], [0, 0, 1, 1], [], []>} : vector<8x32xf32>, vector<32x8xf32>, vector<8x8xf32> -> vector<8x8xf32>
    %c0_198 = arith.constant 0 : index
    %c2_199 = arith.constant 2 : index
    %c0_200 = arith.constant 0 : index
    %c0_201 = arith.constant 0 : index
    %208 = vector.load %arg8[%c0_198, %c2_199, %c0_200, %c0_201] : memref<3x4x1x8xf32, #tpu.memory_space<vmem>>, vector<1x1x1x8xf32>
    %209 = vector.shape_cast %208 : vector<1x1x1x8xf32> to vector<1x8xf32>
    %210 = vector.broadcast %209 : vector<1x8xf32> to vector<8x8xf32>
    %211 = arith.addf %207, %210 : vector<8x8xf32>
    %c1_202 = arith.constant 1 : index
    %c2_203 = arith.constant 2 : index
    %c0_204 = arith.constant 0 : index
    %c0_205 = arith.constant 0 : index
    %212 = vector.load %arg7[%c1_202, %c2_203, %c0_204, %c0_205] : memref<3x4x32x8xf32, #tpu.memory_space<vmem>>, vector<1x1x32x8xf32>
    %213 = vector.shape_cast %212 : vector<1x1x32x8xf32> to vector<32x8xf32>
    %cst_206 = arith.constant dense<0.000000e+00> : vector<8x8xf32>
    %214 = tpu.matmul %1, %213, %cst_206 {dimension_numbers = #tpu.dot_dimension_numbers<[1], [0], [0], [1], [0, 0, 1, 1], [], []>} : vector<8x32xf32>, vector<32x8xf32>, vector<8x8xf32> -> vector<8x8xf32>
    %c1_207 = arith.constant 1 : index
    %c2_208 = arith.constant 2 : index
    %c0_209 = arith.constant 0 : index
    %c0_210 = arith.constant 0 : index
    %215 = vector.load %arg8[%c1_207, %c2_208, %c0_209, %c0_210] : memref<3x4x1x8xf32, #tpu.memory_space<vmem>>, vector<1x1x1x8xf32>
    %216 = vector.shape_cast %215 : vector<1x1x1x8xf32> to vector<1x8xf32>
    %217 = vector.broadcast %216 : vector<1x8xf32> to vector<8x8xf32>
    %218 = arith.addf %214, %217 : vector<8x8xf32>
    %c2_211 = arith.constant 2 : index
    %c2_212 = arith.constant 2 : index
    %c0_213 = arith.constant 0 : index
    %c0_214 = arith.constant 0 : index
    %219 = vector.load %arg7[%c2_211, %c2_212, %c0_213, %c0_214] : memref<3x4x32x8xf32, #tpu.memory_space<vmem>>, vector<1x1x32x8xf32>
    %220 = vector.shape_cast %219 : vector<1x1x32x8xf32> to vector<32x8xf32>
    %cst_215 = arith.constant dense<0.000000e+00> : vector<8x8xf32>
    %221 = tpu.matmul %1, %220, %cst_215 {dimension_numbers = #tpu.dot_dimension_numbers<[1], [0], [0], [1], [0, 0, 1, 1], [], []>} : vector<8x32xf32>, vector<32x8xf32>, vector<8x8xf32> -> vector<8x8xf32>
    %c2_216 = arith.constant 2 : index
    %c2_217 = arith.constant 2 : index
    %c0_218 = arith.constant 0 : index
    %c0_219 = arith.constant 0 : index
    %222 = vector.load %arg8[%c2_216, %c2_217, %c0_218, %c0_219] : memref<3x4x1x8xf32, #tpu.memory_space<vmem>>, vector<1x1x1x8xf32>
    %223 = vector.shape_cast %222 : vector<1x1x1x8xf32> to vector<1x8xf32>
    %224 = vector.broadcast %223 : vector<1x8xf32> to vector<8x8xf32>
    %225 = arith.addf %221, %224 : vector<8x8xf32>
    %c0_220 = arith.constant 0 : index
    %c3_221 = arith.constant 3 : index
    %c0_222 = arith.constant 0 : index
    %c0_223 = arith.constant 0 : index
    %226 = vector.load %arg7[%c0_220, %c3_221, %c0_222, %c0_223] : memref<3x4x32x8xf32, #tpu.memory_space<vmem>>, vector<1x1x32x8xf32>
    %227 = vector.shape_cast %226 : vector<1x1x32x8xf32> to vector<32x8xf32>
    %cst_224 = arith.constant dense<0.000000e+00> : vector<8x8xf32>
    %228 = tpu.matmul %162, %227, %cst_224 {dimension_numbers = #tpu.dot_dimension_numbers<[1], [0], [0], [1], [0, 0, 1, 1], [], []>} : vector<8x32xf32>, vector<32x8xf32>, vector<8x8xf32> -> vector<8x8xf32>
    %c0_225 = arith.constant 0 : index
    %c3_226 = arith.constant 3 : index
    %c0_227 = arith.constant 0 : index
    %c0_228 = arith.constant 0 : index
    %229 = vector.load %arg8[%c0_225, %c3_226, %c0_227, %c0_228] : memref<3x4x1x8xf32, #tpu.memory_space<vmem>>, vector<1x1x1x8xf32>
    %230 = vector.shape_cast %229 : vector<1x1x1x8xf32> to vector<1x8xf32>
    %231 = vector.broadcast %230 : vector<1x8xf32> to vector<8x8xf32>
    %232 = arith.addf %228, %231 : vector<8x8xf32>
    %c1_229 = arith.constant 1 : index
    %c3_230 = arith.constant 3 : index
    %c0_231 = arith.constant 0 : index
    %c0_232 = arith.constant 0 : index
    %233 = vector.load %arg7[%c1_229, %c3_230, %c0_231, %c0_232] : memref<3x4x32x8xf32, #tpu.memory_space<vmem>>, vector<1x1x32x8xf32>
    %234 = vector.shape_cast %233 : vector<1x1x32x8xf32> to vector<32x8xf32>
    %cst_233 = arith.constant dense<0.000000e+00> : vector<8x8xf32>
    %235 = tpu.matmul %1, %234, %cst_233 {dimension_numbers = #tpu.dot_dimension_numbers<[1], [0], [0], [1], [0, 0, 1, 1], [], []>} : vector<8x32xf32>, vector<32x8xf32>, vector<8x8xf32> -> vector<8x8xf32>
    %c1_234 = arith.constant 1 : index
    %c3_235 = arith.constant 3 : index
    %c0_236 = arith.constant 0 : index
    %c0_237 = arith.constant 0 : index
    %236 = vector.load %arg8[%c1_234, %c3_235, %c0_236, %c0_237] : memref<3x4x1x8xf32, #tpu.memory_space<vmem>>, vector<1x1x1x8xf32>
    %237 = vector.shape_cast %236 : vector<1x1x1x8xf32> to vector<1x8xf32>
    %238 = vector.broadcast %237 : vector<1x8xf32> to vector<8x8xf32>
    %239 = arith.addf %235, %238 : vector<8x8xf32>
    %c2_238 = arith.constant 2 : index
    %c3_239 = arith.constant 3 : index
    %c0_240 = arith.constant 0 : index
    %c0_241 = arith.constant 0 : index
    %240 = vector.load %arg7[%c2_238, %c3_239, %c0_240, %c0_241] : memref<3x4x32x8xf32, #tpu.memory_space<vmem>>, vector<1x1x32x8xf32>
    %241 = vector.shape_cast %240 : vector<1x1x32x8xf32> to vector<32x8xf32>
    %cst_242 = arith.constant dense<0.000000e+00> : vector<8x8xf32>
    %242 = tpu.matmul %1, %241, %cst_242 {dimension_numbers = #tpu.dot_dimension_numbers<[1], [0], [0], [1], [0, 0, 1, 1], [], []>} : vector<8x32xf32>, vector<32x8xf32>, vector<8x8xf32> -> vector<8x8xf32>
    %c2_243 = arith.constant 2 : index
    %c3_244 = arith.constant 3 : index
    %c0_245 = arith.constant 0 : index
    %c0_246 = arith.constant 0 : index
    %243 = vector.load %arg8[%c2_243, %c3_244, %c0_245, %c0_246] : memref<3x4x1x8xf32, #tpu.memory_space<vmem>>, vector<1x1x1x8xf32>
    %244 = vector.shape_cast %243 : vector<1x1x1x8xf32> to vector<1x8xf32>
    %245 = vector.broadcast %244 : vector<1x8xf32> to vector<8x8xf32>
    %246 = arith.addf %242, %245 : vector<8x8xf32>
    %cst_247 = arith.constant dense<0.000000e+00> : vector<8x8xf32>
    %247 = tpu.matmul %169, %176, %cst_247 {dimension_numbers = #tpu.dot_dimension_numbers<[1], [1], [0], [0], [0, 0, 1, 0], [], []>} : vector<8x8xf32>, vector<8x8xf32>, vector<8x8xf32> -> vector<8x8xf32>
    %cst_248 = arith.constant dense<0xFF800000> : vector<8xf32>
    %248 = vector.multi_reduction <maximumf>, %247, %cst_248 [1] : vector<8x8xf32> to vector<8xf32>
    %249 = vector.shape_cast %248 : vector<8xf32> to vector<8x1xf32>
    %250 = vector.broadcast %249 : vector<8x1xf32> to vector<8x8xf32>
    %251 = arith.subf %247, %250 : vector<8x8xf32>
    %252 = math.exp %251 : vector<8x8xf32>
    %cst_249 = arith.constant dense<0.000000e+00> : vector<8xf32>
    %253 = vector.multi_reduction <add>, %252, %cst_249 [1] : vector<8x8xf32> to vector<8xf32>
    %254 = vector.shape_cast %253 : vector<8xf32> to vector<8x1xf32>
    %255 = vector.broadcast %254 : vector<8x1xf32> to vector<8x8xf32>
    %256 = arith.divf %252, %255 : vector<8x8xf32>
    %cst_250 = arith.constant dense<0.000000e+00> : vector<8x8xf32>
    %257 = tpu.matmul %256, %183, %cst_250 {dimension_numbers = #tpu.dot_dimension_numbers<[1], [0], [0], [1], [0, 0, 1, 1], [], []>} : vector<8x8xf32>, vector<8x8xf32>, vector<8x8xf32> -> vector<8x8xf32>
    %cst_251 = arith.constant dense<0.000000e+00> : vector<8x8xf32>
    %258 = tpu.matmul %190, %197, %cst_251 {dimension_numbers = #tpu.dot_dimension_numbers<[1], [1], [0], [0], [0, 0, 1, 0], [], []>} : vector<8x8xf32>, vector<8x8xf32>, vector<8x8xf32> -> vector<8x8xf32>
    %cst_252 = arith.constant dense<0xFF800000> : vector<8xf32>
    %259 = vector.multi_reduction <maximumf>, %258, %cst_252 [1] : vector<8x8xf32> to vector<8xf32>
    %260 = vector.shape_cast %259 : vector<8xf32> to vector<8x1xf32>
    %261 = vector.broadcast %260 : vector<8x1xf32> to vector<8x8xf32>
    %262 = arith.subf %258, %261 : vector<8x8xf32>
    %263 = math.exp %262 : vector<8x8xf32>
    %cst_253 = arith.constant dense<0.000000e+00> : vector<8xf32>
    %264 = vector.multi_reduction <add>, %263, %cst_253 [1] : vector<8x8xf32> to vector<8xf32>
    %265 = vector.shape_cast %264 : vector<8xf32> to vector<8x1xf32>
    %266 = vector.broadcast %265 : vector<8x1xf32> to vector<8x8xf32>
    %267 = arith.divf %263, %266 : vector<8x8xf32>
    %cst_254 = arith.constant dense<0.000000e+00> : vector<8x8xf32>
    %268 = tpu.matmul %267, %204, %cst_254 {dimension_numbers = #tpu.dot_dimension_numbers<[1], [0], [0], [1], [0, 0, 1, 1], [], []>} : vector<8x8xf32>, vector<8x8xf32>, vector<8x8xf32> -> vector<8x8xf32>
    %cst_255 = arith.constant dense<0.000000e+00> : vector<8x8xf32>
    %269 = tpu.matmul %211, %218, %cst_255 {dimension_numbers = #tpu.dot_dimension_numbers<[1], [1], [0], [0], [0, 0, 1, 0], [], []>} : vector<8x8xf32>, vector<8x8xf32>, vector<8x8xf32> -> vector<8x8xf32>
    %cst_256 = arith.constant dense<0xFF800000> : vector<8xf32>
    %270 = vector.multi_reduction <maximumf>, %269, %cst_256 [1] : vector<8x8xf32> to vector<8xf32>
    %271 = vector.shape_cast %270 : vector<8xf32> to vector<8x1xf32>
    %272 = vector.broadcast %271 : vector<8x1xf32> to vector<8x8xf32>
    %273 = arith.subf %269, %272 : vector<8x8xf32>
    %274 = math.exp %273 : vector<8x8xf32>
    %cst_257 = arith.constant dense<0.000000e+00> : vector<8xf32>
    %275 = vector.multi_reduction <add>, %274, %cst_257 [1] : vector<8x8xf32> to vector<8xf32>
    %276 = vector.shape_cast %275 : vector<8xf32> to vector<8x1xf32>
    %277 = vector.broadcast %276 : vector<8x1xf32> to vector<8x8xf32>
    %278 = arith.divf %274, %277 : vector<8x8xf32>
    %cst_258 = arith.constant dense<0.000000e+00> : vector<8x8xf32>
    %279 = tpu.matmul %278, %225, %cst_258 {dimension_numbers = #tpu.dot_dimension_numbers<[1], [0], [0], [1], [0, 0, 1, 1], [], []>} : vector<8x8xf32>, vector<8x8xf32>, vector<8x8xf32> -> vector<8x8xf32>
    %cst_259 = arith.constant dense<0.000000e+00> : vector<8x8xf32>
    %280 = tpu.matmul %232, %239, %cst_259 {dimension_numbers = #tpu.dot_dimension_numbers<[1], [1], [0], [0], [0, 0, 1, 0], [], []>} : vector<8x8xf32>, vector<8x8xf32>, vector<8x8xf32> -> vector<8x8xf32>
    %cst_260 = arith.constant dense<0xFF800000> : vector<8xf32>
    %281 = vector.multi_reduction <maximumf>, %280, %cst_260 [1] : vector<8x8xf32> to vector<8xf32>
    %282 = vector.shape_cast %281 : vector<8xf32> to vector<8x1xf32>
    %283 = vector.broadcast %282 : vector<8x1xf32> to vector<8x8xf32>
    %284 = arith.subf %280, %283 : vector<8x8xf32>
    %285 = math.exp %284 : vector<8x8xf32>
    %cst_261 = arith.constant dense<0.000000e+00> : vector<8xf32>
    %286 = vector.multi_reduction <add>, %285, %cst_261 [1] : vector<8x8xf32> to vector<8xf32>
    %287 = vector.shape_cast %286 : vector<8xf32> to vector<8x1xf32>
    %288 = vector.broadcast %287 : vector<8x1xf32> to vector<8x8xf32>
    %289 = arith.divf %285, %288 : vector<8x8xf32>
    %cst_262 = arith.constant dense<0.000000e+00> : vector<8x8xf32>
    %290 = tpu.matmul %289, %246, %cst_262 {dimension_numbers = #tpu.dot_dimension_numbers<[1], [0], [0], [1], [0, 0, 1, 1], [], []>} : vector<8x8xf32>, vector<8x8xf32>, vector<8x8xf32> -> vector<8x8xf32>
    %291 = tpu.concatenate %257, %268, %279, %290 in 1 : vector<8x8xf32>, vector<8x8xf32>, vector<8x8xf32>, vector<8x8xf32> -> vector<8x32xf32>
    %c0_263 = arith.constant 0 : index
    %c0_264 = arith.constant 0 : index
    %292 = vector.load %arg9[%c0_263, %c0_264] : memref<32x32xf32, #tpu.memory_space<vmem>>, vector<32x32xf32>
    %cst_265 = arith.constant dense<0.000000e+00> : vector<8x32xf32>
    %293 = tpu.matmul %291, %292, %cst_265 {dimension_numbers = #tpu.dot_dimension_numbers<[1], [0], [0], [1], [0, 0, 1, 1], [], []>} : vector<8x32xf32>, vector<32x32xf32>, vector<8x32xf32> -> vector<8x32xf32>
    %c0_266 = arith.constant 0 : index
    %c0_267 = arith.constant 0 : index
    %294 = vector.load %arg10[%c0_266, %c0_267] : memref<1x32xf32, #tpu.memory_space<vmem>>, vector<1x32xf32>
    %295 = vector.broadcast %294 : vector<1x32xf32> to vector<8x32xf32>
    %296 = arith.addf %293, %295 : vector<8x32xf32>
    %297 = arith.addf %162, %296 : vector<8x32xf32>
    %cst_268 = arith.constant dense<0.000000e+00> : vector<8xf32>
    %298 = vector.multi_reduction <add>, %297, %cst_268 [1] : vector<8x32xf32> to vector<8xf32>
    %299 = vector.shape_cast %298 : vector<8xf32> to vector<8x1xf32>
    %cst_269 = arith.constant 3.200000e+01 : f32
    %300 = vector.broadcast %cst_269 : f32 to vector<8x1xf32>
    %301 = arith.divf %299, %300 : vector<8x1xf32>
    %302 = arith.mulf %297, %297 : vector<8x32xf32>
    %cst_270 = arith.constant dense<0.000000e+00> : vector<8xf32>
    %303 = vector.multi_reduction <add>, %302, %cst_270 [1] : vector<8x32xf32> to vector<8xf32>
    %304 = vector.shape_cast %303 : vector<8xf32> to vector<8x1xf32>
    %cst_271 = arith.constant 3.200000e+01 : f32
    %305 = vector.broadcast %cst_271 : f32 to vector<8x1xf32>
    %306 = arith.divf %304, %305 : vector<8x1xf32>
    %307 = arith.mulf %301, %301 : vector<8x1xf32>
    %308 = arith.subf %306, %307 : vector<8x1xf32>
    %309 = vector.broadcast %301 : vector<8x1xf32> to vector<8x32xf32>
    %310 = arith.subf %297, %309 : vector<8x32xf32>
    %cst_272 = arith.constant 9.99999974E-6 : f32
    %311 = vector.broadcast %cst_272 : f32 to vector<8x1xf32>
    %312 = arith.addf %308, %311 : vector<8x1xf32>
    %313 = math.rsqrt %312 : vector<8x1xf32>
    %314 = vector.broadcast %313 : vector<8x1xf32> to vector<8x32xf32>
    %315 = arith.mulf %310, %314 : vector<8x32xf32>
    %c1_273 = arith.constant 1 : index
    %c0_274 = arith.constant 0 : index
    %c0_275 = arith.constant 0 : index
    %316 = vector.load %arg15[%c1_273, %c0_274, %c0_275] : memref<3x1x32xf32, #tpu.memory_space<vmem>>, vector<1x1x32xf32>
    %317 = vector.shape_cast %316 : vector<1x1x32xf32> to vector<1x32xf32>
    %318 = vector.broadcast %317 : vector<1x32xf32> to vector<8x32xf32>
    %319 = arith.mulf %315, %318 : vector<8x32xf32>
    %c1_276 = arith.constant 1 : index
    %c0_277 = arith.constant 0 : index
    %c0_278 = arith.constant 0 : index
    %320 = vector.load %arg16[%c1_276, %c0_277, %c0_278] : memref<3x1x32xf32, #tpu.memory_space<vmem>>, vector<1x1x32xf32>
    %321 = vector.shape_cast %320 : vector<1x1x32xf32> to vector<1x32xf32>
    %322 = vector.broadcast %321 : vector<1x32xf32> to vector<8x32xf32>
    %323 = arith.addf %319, %322 : vector<8x32xf32>
    %c0_279 = arith.constant 0 : index
    %c0_280 = arith.constant 0 : index
    %324 = vector.load %arg11[%c0_279, %c0_280] : memref<32x128xf32, #tpu.memory_space<vmem>>, vector<32x128xf32>
    %cst_281 = arith.constant dense<0.000000e+00> : vector<8x128xf32>
    %325 = tpu.matmul %323, %324, %cst_281 {dimension_numbers = #tpu.dot_dimension_numbers<[1], [0], [0], [1], [0, 0, 1, 1], [], []>} : vector<8x32xf32>, vector<32x128xf32>, vector<8x128xf32> -> vector<8x128xf32>
    %c0_282 = arith.constant 0 : index
    %c0_283 = arith.constant 0 : index
    %326 = vector.load %arg12[%c0_282, %c0_283] : memref<1x128xf32, #tpu.memory_space<vmem>>, vector<1x128xf32>
    %327 = vector.broadcast %326 : vector<1x128xf32> to vector<8x128xf32>
    %328 = arith.addf %325, %327 : vector<8x128xf32>
    %cst_284 = arith.constant 0.000000e+00 : f32
    %329 = vector.broadcast %cst_284 : f32 to vector<8x128xf32>
    %330 = arith.maximumf %328, %329 : vector<8x128xf32>
    %c0_285 = arith.constant 0 : index
    %c0_286 = arith.constant 0 : index
    %331 = vector.load %arg13[%c0_285, %c0_286] : memref<128x32xf32, #tpu.memory_space<vmem>>, vector<128x32xf32>
    %cst_287 = arith.constant dense<0.000000e+00> : vector<8x32xf32>
    %332 = tpu.matmul %330, %331, %cst_287 {dimension_numbers = #tpu.dot_dimension_numbers<[1], [0], [0], [1], [0, 0, 1, 1], [], []>} : vector<8x128xf32>, vector<128x32xf32>, vector<8x32xf32> -> vector<8x32xf32>
    %c0_288 = arith.constant 0 : index
    %c0_289 = arith.constant 0 : index
    %333 = vector.load %arg14[%c0_288, %c0_289] : memref<1x32xf32, #tpu.memory_space<vmem>>, vector<1x32xf32>
    %334 = vector.broadcast %333 : vector<1x32xf32> to vector<8x32xf32>
    %335 = arith.addf %332, %334 : vector<8x32xf32>
    %336 = arith.addf %323, %335 : vector<8x32xf32>
    %cst_290 = arith.constant dense<0.000000e+00> : vector<8xf32>
    %337 = vector.multi_reduction <add>, %336, %cst_290 [1] : vector<8x32xf32> to vector<8xf32>
    %338 = vector.shape_cast %337 : vector<8xf32> to vector<8x1xf32>
    %cst_291 = arith.constant 3.200000e+01 : f32
    %339 = vector.broadcast %cst_291 : f32 to vector<8x1xf32>
    %340 = arith.divf %338, %339 : vector<8x1xf32>
    %341 = arith.mulf %336, %336 : vector<8x32xf32>
    %cst_292 = arith.constant dense<0.000000e+00> : vector<8xf32>
    %342 = vector.multi_reduction <add>, %341, %cst_292 [1] : vector<8x32xf32> to vector<8xf32>
    %343 = vector.shape_cast %342 : vector<8xf32> to vector<8x1xf32>
    %cst_293 = arith.constant 3.200000e+01 : f32
    %344 = vector.broadcast %cst_293 : f32 to vector<8x1xf32>
    %345 = arith.divf %343, %344 : vector<8x1xf32>
    %346 = arith.mulf %340, %340 : vector<8x1xf32>
    %347 = arith.subf %345, %346 : vector<8x1xf32>
    %348 = vector.broadcast %340 : vector<8x1xf32> to vector<8x32xf32>
    %349 = arith.subf %336, %348 : vector<8x32xf32>
    %cst_294 = arith.constant 9.99999974E-6 : f32
    %350 = vector.broadcast %cst_294 : f32 to vector<8x1xf32>
    %351 = arith.addf %347, %350 : vector<8x1xf32>
    %352 = math.rsqrt %351 : vector<8x1xf32>
    %353 = vector.broadcast %352 : vector<8x1xf32> to vector<8x32xf32>
    %354 = arith.mulf %349, %353 : vector<8x32xf32>
    %c2_295 = arith.constant 2 : index
    %c0_296 = arith.constant 0 : index
    %c0_297 = arith.constant 0 : index
    %355 = vector.load %arg15[%c2_295, %c0_296, %c0_297] : memref<3x1x32xf32, #tpu.memory_space<vmem>>, vector<1x1x32xf32>
    %356 = vector.shape_cast %355 : vector<1x1x32xf32> to vector<1x32xf32>
    %357 = vector.broadcast %356 : vector<1x32xf32> to vector<8x32xf32>
    %358 = arith.mulf %354, %357 : vector<8x32xf32>
    %c2_298 = arith.constant 2 : index
    %c0_299 = arith.constant 0 : index
    %c0_300 = arith.constant 0 : index
    %359 = vector.load %arg16[%c2_298, %c0_299, %c0_300] : memref<3x1x32xf32, #tpu.memory_space<vmem>>, vector<1x1x32xf32>
    %360 = vector.shape_cast %359 : vector<1x1x32xf32> to vector<1x32xf32>
    %361 = vector.broadcast %360 : vector<1x32xf32> to vector<8x32xf32>
    %362 = arith.addf %358, %361 : vector<8x32xf32>
    %c0_301 = arith.constant 0 : index
    %c0_302 = arith.constant 0 : index
    %363 = vector.load %arg17[%c0_301, %c0_302] : memref<8x32xf32, #tpu.memory_space<vmem>>, vector<8x32xf32>
    tpu.vector_store %arg17[%c0_301, %c0_302], %362 {strides = array<i32>} : memref<8x32xf32, #tpu.memory_space<vmem>>, vector<8x32xf32>,
    return
  }
  func.func @transform_0(%arg0: i32) -> (i32, i32) {
    %c0_i32 = arith.constant 0 : i32
    %c0_i32_0 = arith.constant 0 : i32
    return %arg0, %c0_i32 : i32, i32
  }
  func.func @transform_1(%arg0: i32) -> (i32, i32) {
    %c0_i32 = arith.constant 0 : i32
    %c0_i32_0 = arith.constant 0 : i32
    return %arg0, %c0_i32 : i32, i32
  }
  func.func @transform_2(%arg0: i32) -> (i32, i32, i32, i32) {
    %c0_i32 = arith.constant 0 : i32
    %c0_i32_0 = arith.constant 0 : i32
    %c0_i32_1 = arith.constant 0 : i32
    %c0_i32_2 = arith.constant 0 : i32
    %c0_i32_3 = arith.constant 0 : i32
    return %c0_i32, %c0_i32_0, %c0_i32_1, %c0_i32_2 : i32, i32, i32, i32
  }
  func.func @transform_3(%arg0: i32) -> (i32, i32, i32, i32) {
    %c0_i32 = arith.constant 0 : i32
    %c0_i32_0 = arith.constant 0 : i32
    %c0_i32_1 = arith.constant 0 : i32
    %c0_i32_2 = arith.constant 0 : i32
    %c0_i32_3 = arith.constant 0 : i32
    return %c0_i32, %c0_i32_0, %c0_i32_1, %c0_i32_2 : i32, i32, i32, i32
  }
  func.func @transform_4(%arg0: i32) -> (i32, i32) {
    %c0_i32 = arith.constant 0 : i32
    %c0_i32_0 = arith.constant 0 : i32
    %c0_i32_1 = arith.constant 0 : i32
    return %c0_i32, %c0_i32_0 : i32, i32
  }
  func.func @transform_5(%arg0: i32) -> (i32, i32) {
    %c0_i32 = arith.constant 0 : i32
    %c0_i32_0 = arith.constant 0 : i32
    %c0_i32_1 = arith.constant 0 : i32
    return %c0_i32, %c0_i32_0 : i32, i32
  }
  func.func @transform_6(%arg0: i32) -> (i32, i32, i32, i32) {
    %c0_i32 = arith.constant 0 : i32
    %c0_i32_0 = arith.constant 0 : i32
    %c0_i32_1 = arith.constant 0 : i32
    %c0_i32_2 = arith.constant 0 : i32
    %c0_i32_3 = arith.constant 0 : i32
    return %c0_i32, %c0_i32_0, %c0_i32_1, %c0_i32_2 : i32, i32, i32, i32
  }
  func.func @transform_7(%arg0: i32) -> (i32, i32, i32, i32) {
    %c0_i32 = arith.constant 0 : i32
    %c0_i32_0 = arith.constant 0 : i32
    %c0_i32_1 = arith.constant 0 : i32
    %c0_i32_2 = arith.constant 0 : i32
    %c0_i32_3 = arith.constant 0 : i32
    return %c0_i32, %c0_i32_0, %c0_i32_1, %c0_i32_2 : i32, i32, i32, i32
  }
  func.func @transform_8(%arg0: i32) -> (i32, i32) {
    %c0_i32 = arith.constant 0 : i32
    %c0_i32_0 = arith.constant 0 : i32
    %c0_i32_1 = arith.constant 0 : i32
    return %c0_i32, %c0_i32_0 : i32, i32
  }
  func.func @transform_9(%arg0: i32) -> (i32, i32) {
    %c0_i32 = arith.constant 0 : i32
    %c0_i32_0 = arith.constant 0 : i32
    %c0_i32_1 = arith.constant 0 : i32
    return %c0_i32, %c0_i32_0 : i32, i32
  }
  func.func @transform_10(%arg0: i32) -> (i32, i32) {
    %c0_i32 = arith.constant 0 : i32
    %c0_i32_0 = arith.constant 0 : i32
    %c0_i32_1 = arith.constant 0 : i32
    return %c0_i32, %c0_i32_0 : i32, i32
  }
  func.func @transform_11(%arg0: i32) -> (i32, i32) {
    %c0_i32 = arith.constant 0 : i32
    %c0_i32_0 = arith.constant 0 : i32
    %c0_i32_1 = arith.constant 0 : i32
    return %c0_i32, %c0_i32_0 : i32, i32
  }
  func.func @transform_12(%arg0: i32) -> (i32, i32) {
    %c0_i32 = arith.constant 0 : i32
    %c0_i32_0 = arith.constant 0 : i32
    %c0_i32_1 = arith.constant 0 : i32
    return %c0_i32, %c0_i32_0 : i32, i32
  }
  func.func @transform_13(%arg0: i32) -> (i32, i32) {
    %c0_i32 = arith.constant 0 : i32
    %c0_i32_0 = arith.constant 0 : i32
    %c0_i32_1 = arith.constant 0 : i32
    return %c0_i32, %c0_i32_0 : i32, i32
  }
  func.func @transform_14(%arg0: i32) -> (i32, i32, i32) {
    %c0_i32 = arith.constant 0 : i32
    %c0_i32_0 = arith.constant 0 : i32
    %c0_i32_1 = arith.constant 0 : i32
    %c0_i32_2 = arith.constant 0 : i32
    return %c0_i32, %c0_i32_0, %c0_i32_1 : i32, i32, i32
  }
  func.func @transform_15(%arg0: i32) -> (i32, i32, i32) {
    %c0_i32 = arith.constant 0 : i32
    %c0_i32_0 = arith.constant 0 : i32
    %c0_i32_1 = arith.constant 0 : i32
    %c0_i32_2 = arith.constant 0 : i32
    return %c0_i32, %c0_i32_0, %c0_i32_1 : i32, i32, i32
  }
  func.func @transform_16(%arg0: i32) -> (i32, i32) {
    %c0_i32 = arith.constant 0 : i32
    %c0_i32_0 = arith.constant 0 : i32
    return %arg0, %c0_i32 : i32, i32
  }
}

</mosaic_0001>

<bundles_post_ra>
// kernel: decoder_layer_forward.1
= control target key start
LH: loop header
LB: loop body
LE: loop exit
PB: predicated region body
PF: predicated region fallthrough
CT: control target
= control target key end

     0   :  { %s6359_s0 = inlined_call_operand.vmem [shape: f32[16,32], index: 0, kind: input, shape index: {}]   ;;  %s6360_s1 = inlined_call_operand.vmem [shape: f32[16,32], index: 1, kind: input, shape index: {}]   ;;  %s6361_s2 = inlined_call_operand.vmem [shape: f32[3,4,32,8], index: 2, kind: input, shape index: {}]   ;;  %s6362_s3 = inlined_call_operand.vmem [shape: f32[3,4,1,8], index: 3, kind: input, shape index: {}]   ;;  %s6363_s4 = inlined_call_operand.vmem [shape: f32[32,32], index: 4, kind: input, shape index: {}]   ;;  %s6364_s5 = inlined_call_operand.vmem [shape: f32[1,32], index: 5, kind: input, shape index: {}]   ;;  %s6365_s6 = inlined_call_operand.vmem [shape: f32[3,4,32,8], index: 6, kind: input, shape index: {}]   ;;  %s6366_s7 = inlined_call_operand.vmem [shape: f32[3,4,1,8], index: 7, kind: input, shape index: {}]   ;;  %s6367_s8 = inlined_call_operand.vmem [shape: f32[32,32], index: 8, kind: input, shape index: {}]   ;;  %s6368_s9 = inlined_call_operand.vmem [shape: f32[1,32], index: 9, kind: input, shape index: {}]   ;;  %s6369_s10 = inlined_call_operand.vmem [shape: f32[32,128], index: 10, kind: input, shape index: {}]   ;;  %s6370_s11 = inlined_call_operand.vmem [shape: f32[1,128], index: 11, kind: input, shape index: {}]   ;;  %s6371_s12 = inlined_call_operand.vmem [shape: f32[128,32], index: 12, kind: input, shape index: {}]   ;;  %s6372_s13 = inlined_call_operand.vmem [shape: f32[1,32], index: 13, kind: input, shape index: {}]   ;;  %s6373_s14 = inlined_call_operand.vmem [shape: f32[3,1,32], index: 14, kind: input, shape index: {}]   ;;  %s6374_s15 = inlined_call_operand.vmem [shape: f32[3,1,32], index: 15, kind: input, shape index: {}]   ;;  %s6375_s16 = inlined_call_operand.hbm [shape: f32[16,32], index: 16, kind: output, shape index: {}]  }
   0x1   :  { %6385 = sst [smem:[#allocation11_spill]] %s6359_s0 }
   0x2   :  { %6386 = sst [smem:[#allocation12_spill]] %s6360_s1 }
   0x3   :  { %21 = vsyncpa [#allocation3], 0 }
   0x4   :  { %23 = vsyncpa [#allocation3 + $0x1], 0  ;;  %s5421_s21 = smov 0   ;;  %s5423_s22 = smov 0  }
   0x5   :  { %s5425_s23 = smov 0   ;;  %s5427_s24 = smov 0  }
   0x6 LB: > { %6387 = sst [smem:[#allocation5_spill]] %s5316_s21  ;;  %s5442_s25 = sadd.s32 4294967295, %s5328_s24   ;;  %s5328_s24 = sphi %s5427_s24, %s6403_s24   ;;  %s5324_s23 = sphi %s5425_s23, %s6405_s23   ;;  %s5320_s22 = sphi %s5423_s22, %s6407_s22   ;;  %s5316_s21 = sphi %s5421_s21, %s6406_s21  }
   0x7   : > { %6388 = sst [smem:[#allocation6_spill]] %s5324_s23  ;;  %s4380_s26 = sadd.s32 4294967294, %s5328_s24  }
   0x8   : > { %6389 = sst [smem:[#allocation7_spill]] %s5328_s24  ;;  %s5446_s27 = sadd.s32 1, %s5328_s24  }
   0x9   : > { %6390 = sst [smem:[#allocation8_spill]] %s5446_s27  ;;  %s382_s28 = sadd.s32 1, %s5324_s23 }
   0xa   : > { %s379_s29 = ssub.s32 %s5328_s24, %s5446_s27  ;;  %p392_p0 = scmp.ne.s32.totalorder %s5324_s23, %s5320_s22 }
   0xb   : > { %p380_p1 = scmp.eq.s32.totalorder %s379_s29, 0  ;;  %p393_p2 = scmp.eq.s32.totalorder %s5442_s25, 1 }
   0xc   : > { %p398_p3 = scmp.ne.s32.totalorder %s5320_s22, %s5316_s21  ;;  %p399_p4 = scmp.eq.s32.totalorder %s4380_s26, 1 }
   0xd   : > { %s5457_s30 = scalar_select %p380_p1, %s5324_s23, %s382_s28  }
   0xe   : > { %p5459_p5 = por %p393_p2, %p392_p0  ;;  %p5463_p6 = por %p399_p4, %p398_p3 }
   0xf   : > { %6391 = sst [smem:[#allocation9_spill]] %s5457_s30  ;;  %p4383_p7 = scmp.ge.s32.totalorder %s5328_s24, 1 }
  0x10   : > { %s6393_s17 = scalar_select %p5463_p6, 1, 0 }
  0x11   : > { %p473_p8 = scmp.lt.s32.totalorder %s5328_s24, 3 }
  0x12   : > { %6394 = sst [smem:[#allocation10_spill]] %s6393_s17 }
  0x13   : > { %p474_p9 = pnand %p4383_p7, %p473_p8 }
  0x14   : > { %p526_p10 = scmp.lt.s32.totalorder (!%p474_p9), %s5442_s25, 1  ;;  %s6395_s19 = sld [smem:[#allocation11_spill]] (!%p474_p9) }
  0x15   : > { %477 = sbr.rel (%p474_p9) target bundleno = 3451 (0xd7b), region = 84  ;;  %s6383_s17 = smov (!%p474_p9), 16  }
  0x16   : > { %s6382_s29 = smov (!%p474_p9), 24   ;;  %s6396_s1 = sld [smem:[#allocation12_spill]] (!%p474_p9) }
  0x17   : > { %s6397_s24 = smov (!%p474_p9), 8   ;;  %s6398_s30 = smov (!%p474_p9), 16  }
  0x1a   : > { %v539_v0 = vld [vmem:[%s6361_s2 + $0x18] sm:$0xff]  ;;  %v5330_v1 = vmov 0.0   ;;  %v538_v2 = vld [vmem:[%s6361_s2 + $0x10] sm:$0xff]  ;;  %vm5331_vm0 = vmmov 0   ;;  %s5480_s28 = scalar_select %p526_p10, %s5442_s25, 1  ;;  %v537_v3 = vld [vmem:[%s6361_s2 + $0x8] sm:$0xff] }
  0x1b   : > { %4774 = vmatprep.subr.mxu1 %v5330_v1  ;;  %4782 = vmatprep.mubr.msk.f32.mxu1 %vm5331_vm0, %v5330_v1  ;;  %v4413_v4 = vld [vmem:[%s6361_s2 + $0xb8] sm:$0xff]  ;;  %v4412_v5 = vld [vmem:[%s6361_s2 + $0xb0] sm:$0xff]  ;;  %v536_v6 = vld [vmem:[%s6361_s2] sm:$0xff]  ;;  %vm547_vm1 = vcmask 261120   ;;  %vm1534_vm2 = vcmask 64512   ;;  %vm2188_vm3 = vcmask 130048  }
  0x1c   : > { %4775 = vmatpush3.msra.mxu1 %v539_v0  ;;  %4818 = vmatprep.subr.mxu0 %v5330_v1  ;;  %s4385_s26 = sshll.u32 %s5480_s28, 3  ;;  %v4411_v7 = vld [vmem:[%s6361_s2 + $0xa8] sm:$0xff]  ;;  %v4392_v9 = vld [vmem:[%s6361_s2 + $0x98] sm:$0xff]  ;;  %v4391_v10 = vld [vmem:[%s6361_s2 + $0x90] sm:$0xff]  ;;  %vm2190_vm4 = vcmask 195584   ;;  %s6399_s28 = smov 24  }
  0x1d   : > { %4776 = vmatprep.subr.mxu1 %v5330_v1  ;;  %4826 = vmatprep.mubr.msk.f32.mxu0 %vm5331_vm0, %v5330_v1  ;;  %s529_s20 = scalar_lea.vmem %s6395_s19, %s4385_s26  ;;  %v4410_v11 = vld [vmem:[%s6361_s2 + $0xa0] sm:$0xff]  ;;  %v4390_v12 = vld [vmem:[%s6361_s2 + $0x88] sm:$0xff]  ;;  %v4427_v13 = vld [vmem:[%s6361_s2 + $0x58] sm:$0xff]  ;;  %s6384_s19 = smov 8  }
  0x1e   : > { %4777 = vmatpush3.msra.mxu1 %v538_v2  ;;  %4819 = vmatpush3.msra.mxu0 %v4413_v4  ;;  %v5509_v8 = vld [vmem:[%s529_s20] sm:$0xff]  ;;  %v4399_v15 = vld [vmem:[%s6361_s2 + $0x118] sm:$0xff]  ;;  %v4426_v16 = vld [vmem:[%s6361_s2 + $0x50] sm:$0xff]  ;;  %s533_s27 = scalar_lea.vmem %s6396_s1, %s4385_s26 }
  0x1f   : > { %4778 = vmatprep.subr.mxu1 %v5330_v1  ;;  %4820 = vmatprep.subr.mxu0 %v5330_v1  ;;  %v4389_v14 = vld [vmem:[%s6361_s2 + $0x80] sm:$0xff]  ;;  %v4398_v17 = vld [vmem:[%s6361_s2 + $0x110] sm:$0xff]  ;;  %v4425_v18 = vld [vmem:[%s6361_s2 + $0x48] sm:$0xff] }
  0x20   : > { %4779 = vmatpush3.msra.mxu1 %v537_v3  ;;  %4821 = vmatpush3.msra.mxu0 %v4412_v5  ;;  %v4397_v19 = vld [vmem:[%s6361_s2 + $0x108] sm:$0xff]  ;;  %v4424_v20 = vld [vmem:[%s6361_s2 + $0x40] sm:$0xff]  ;;  %v4406_v22 = vld [vmem:[%s6361_s2 + $0x38] sm:$0xff] }
  0x21   : > { %4780 = vmatprep.subr.mxu1 %v5330_v1  ;;  %4822 = vmatprep.subr.mxu0 %v5330_v1  ;;  %v4396_v21 = vld [vmem:[%s6361_s2 + $0x100] sm:$0xff]  ;;  %v4405_v23 = vld [vmem:[%s6361_s2 + $0x30] sm:$0xff]  ;;  %v4441_v24 = vld [vmem:[%s6361_s2 + $0x158] sm:$0xff] }
  0x22   : > { %4781 = vmatpush3.msra.mxu1 %v536_v6  ;;  %4823 = vmatpush3.msra.mxu0 %v4411_v7  ;;  %v4404_v25 = vld [vmem:[%s6361_s2 + $0x28] sm:$0xff]  ;;  %v4440_v26 = vld [vmem:[%s6361_s2 + $0x150] sm:$0xff]  ;;  %v4403_v27 = vld [vmem:[%s6361_s2 + $0x20] sm:$0xff] }
  0x23   : > { %4783 = vmatmul.mubr.msk.f32.vlgmr.msra.gmra.mxu1 %vm547_vm1, %v5509_v8  ;;  %4785 = vmatprep.subr.mxu1 %v5330_v1  ;;  %v4420_v28 = vld [vmem:[%s6361_s2 + $0x138] sm:$0xff]  ;;  %v4439_v29 = vld [vmem:[%s6361_s2 + $0x148] sm:$0xff]  ;;  %v4419_v30 = vld [vmem:[%s6361_s2 + $0x130] sm:$0xff] }
  0x24   : > { %4786 = vmatpush3.msra.mxu1 %v4392_v9  ;;  %4793 = vmatprep.mubr.msk.f32.mxu1 %vm5331_vm0, %v5330_v1  ;;  %v4438_v31 = vld [vmem:[%s6361_s2 + $0x140] sm:$0xff]  ;;  %v4418_v32 = vld [vmem:[%s6361_s2 + $0x128] sm:$0xff]  ;;  %v4434_v34 = vld [vmem:[%s6361_s2 + $0xd8] sm:$0xff] }
  0x25   : > { %4787 = vmatprep.subr.mxu1 %v5330_v1  ;;  %4824 = vmatprep.subr.mxu0 %v5330_v1  ;;  %v4417_v33 = vld [vmem:[%s6361_s2 + $0x120] sm:$0xff]  ;;  %v4455_v35 = vld [vmem:[%s6361_s2 + $0xf8] sm:$0xff]  ;;  %v4433_v36 = vld [vmem:[%s6361_s2 + $0xd0] sm:$0xff] }
  0x26   : > { %4788 = vmatpush3.msra.mxu1 %v4391_v10  ;;  %4825 = vmatpush3.msra.mxu0 %v4410_v11  ;;  %v4454_v37 = vld [vmem:[%s6361_s2 + $0xf0] sm:$0xff]  ;;  %v4432_v38 = vld [vmem:[%s6361_s2 + $0xc8] sm:$0xff]  ;;  %v4431_v40 = vld [vmem:[%s6361_s2 + $0xc0] sm:$0xff] }
  0x27   : > { %4789 = vmatprep.subr.mxu1 %v5330_v1  ;;  %4840 = vmatprep.subr.mxu0 %v5330_v1  ;;  %v4453_v39 = vld [vmem:[%s6361_s2 + $0xe8] sm:$0xff]  ;;  %v4448_v41 = vld [vmem:[%s6361_s2 + $0x78] sm:$0xff]  ;;  %v4452_v42 = vld [vmem:[%s6361_s2 + $0xe0] sm:$0xff] }
  0x28   : > { %4790 = vmatpush3.msra.mxu1 %v4390_v12  ;;  %4827 = vmatmul.mubr.msk.f32.vlgmr.msra.gmra.mxu0 %vm547_vm1, %v5509_v8  ;;  %v4447_v43 = vld [vmem:[%s6361_s2 + $0x70] sm:$0xff]  ;;  %v4446_v44 = vld [vmem:[%s6361_s2 + $0x68] sm:$0xff]  ;;  %v4445_v45 = vld [vmem:[%s6361_s2 + $0x60] sm:$0xff] }
  0x29   : > { %4791 = vmatprep.subr.mxu1 %v5330_v1  ;;  %4841 = vmatpush3.msra.mxu0 %v4427_v13  ;;  %v4462_v46 = vld [vmem:[%s6361_s2 + $0x178] sm:$0xff]  ;;  %v4461_v47 = vld [vmem:[%s6361_s2 + $0x170] sm:$0xff]  ;;  %v4460_v48 = vld [vmem:[%s6361_s2 + $0x168] sm:$0xff] }
  0x2a   : > { %4792 = vmatpush3.msra.mxu1 %v4389_v14  ;;  %4842 = vmatprep.subr.mxu0 %v5330_v1  ;;  %v4459_v49 = vld [vmem:[%s6361_s2 + $0x160] sm:$0xff]  ;;  %v4401_v62 = vld [vmem:[%s6362_s3 + $0x8] ss:$0 sm:$0xff] }
  0x2b   : > { %4794 = vmatmul.mubr.msk.f32.vlgmr.msra.gmra.mxu1 %vm547_vm1, %v5509_v8  ;;  %4796 = vmatprep.subr.mxu1 %v5330_v1  ;;  %v4394_v53 = vld [vmem:[%s6362_s3 + $0x4] ss:$0 sm:$0xff]  ;;  %v4415_v56 = vld [vmem:[%s6362_s3 + $0x5] ss:$0 sm:$0xff]  ;;  %v4387_v57 = vld [vmem:[%s6362_s3] ss:$0 sm:$0xff] }
  0x2c   : > { %4797 = vmatpush3.msra.mxu1 %v4399_v15  ;;  %4804 = vmatprep.mubr.msk.f32.mxu1 %vm5331_vm0, %v5330_v1  ;;  %v4408_v5 = vld [vmem:[%s6362_s3 + $0x1] ss:$0 sm:$0xff]  ;;  %v4436_v14 = vld [vmem:[%s6362_s3 + $0x6] ss:$0 sm:$0xff] }
  0x2d   : > { %4798 = vmatprep.subr.mxu1 %v5330_v1  ;;  %4843 = vmatpush3.msra.mxu0 %v4426_v16  ;;  %v4429_v16 = vld [vmem:[%s6362_s3 + $0x2] ss:$0 sm:$0xff] }
  0x2e   : > { %4799 = vmatpush3.msra.mxu1 %v4398_v17  ;;  %4844 = vmatprep.subr.mxu0 %v5330_v1 }
  0x2f   : > { %4800 = vmatprep.subr.mxu1 %v5330_v1  ;;  %4845 = vmatpush3.msra.mxu0 %v4425_v18  ;;  %v4457_v18 = vld [vmem:[%s6362_s3 + $0x7] ss:$0 sm:$0xff] }
  0x30   : > { %4801 = vmatpush3.msra.mxu1 %v4397_v19  ;;  %4846 = vmatprep.subr.mxu0 %v5330_v1 }
  0x31   : > { %4802 = vmatprep.subr.mxu1 %v5330_v1  ;;  %4847 = vmatpush3.msra.mxu0 %v4424_v20 }
  0x32   : > { %4803 = vmatpush3.msra.mxu1 %v4396_v21  ;;  %4848 = vmatprep.mubr.msk.f32.mxu0 %vm5331_vm0, %v5330_v1 }
  0x33   : > { %4805 = vmatmul.mubr.msk.f32.vlgmr.msra.gmra.mxu1 %vm547_vm1, %v5509_v8  ;;  %4807 = vmatprep.subr.mxu1 %v5330_v1 }
  0x34   : > { %4808 = vmatpush3.msra.mxu1 %v4406_v22  ;;  %4815 = vmatprep.mubr.msk.f32.mxu1 %vm5331_vm0, %v5330_v1 }
  0x35   : > { %4809 = vmatprep.subr.mxu1 %v5330_v1  ;;  %4862 = vmatprep.subr.mxu0 %v5330_v1 }
  0x36   : > { %4810 = vmatpush3.msra.mxu1 %v4405_v23  ;;  %4849 = vmatmul.mubr.msk.f32.vlgmr.msra.gmra.mxu0 %vm547_vm1, %v5509_v8 }
  0x37   : > { %4811 = vmatprep.subr.mxu1 %v5330_v1  ;;  %4863 = vmatpush3.msra.mxu0 %v4441_v24  ;;  %v4450_v24 = vld [vmem:[%s6362_s3 + $0x3] ss:$0 sm:$0xff] }
  0x38   : > { %4812 = vmatpush3.msra.mxu1 %v4404_v25  ;;  %4864 = vmatprep.subr.mxu0 %v5330_v1 }
  0x39   : > { %4813 = vmatprep.subr.mxu1 %v5330_v1  ;;  %4865 = vmatpush3.msra.mxu0 %v4440_v26 }
  0x3a   : > { %4814 = vmatpush3.msra.mxu1 %v4403_v27  ;;  %4866 = vmatprep.subr.mxu0 %v5330_v1 }
  0x3b   : > { %4816 = vmatmul.mubr.msk.f32.vlgmr.msra.gmra.mxu1 %vm547_vm1, %v5509_v8  ;;  %4829 = vmatprep.subr.mxu1 %v5330_v1 }
  0x3c   : > { %4830 = vmatpush3.msra.mxu1 %v4420_v28  ;;  %4837 = vmatprep.mubr.msk.f32.mxu1 %vm5331_vm0, %v5330_v1 }
  0x3d   : > { %4831 = vmatprep.subr.mxu1 %v5330_v1  ;;  %4867 = vmatpush3.msra.mxu0 %v4439_v29 }
  0x3e   : > { %4832 = vmatpush3.msra.mxu1 %v4419_v30  ;;  %4868 = vmatprep.subr.mxu0 %v5330_v1 }
  0x3f   : > { %4833 = vmatprep.subr.mxu1 %v5330_v1  ;;  %4869 = vmatpush3.msra.mxu0 %v4438_v31 }
  0x40   : > { %4834 = vmatpush3.msra.mxu1 %v4418_v32  ;;  %4870 = vmatprep.mubr.msk.f32.mxu0 %vm5331_vm0, %v5330_v1 }
  0x41   : > { %4835 = vmatprep.subr.mxu1 %v5330_v1  ;;  %4884 = vmatprep.subr.mxu0 %v5330_v1 }
  0x42   : > { %4836 = vmatpush3.msra.mxu1 %v4417_v33  ;;  %4871 = vmatmul.mubr.msk.f32.vlgmr.msra.gmra.mxu0 %vm547_vm1, %v5509_v8 }
  0x43   : > { %4838 = vmatmul.mubr.msk.f32.vlgmr.msra.gmra.mxu1 %vm547_vm1, %v5509_v8  ;;  %4851 = vmatprep.subr.mxu1 %v5330_v1 }
  0x44   : > { %4852 = vmatpush3.msra.mxu1 %v4434_v34  ;;  %4885 = vmatpush3.msra.mxu0 %v4455_v35 }
  0x45   : > { %4853 = vmatprep.subr.mxu1 %v5330_v1  ;;  %4886 = vmatprep.subr.mxu0 %v5330_v1 }
  0x46   : > { %4854 = vmatpush3.msra.mxu1 %v4433_v36  ;;  %4887 = vmatpush3.msra.mxu0 %v4454_v37 }
  0x47   : > { %4855 = vmatprep.subr.mxu1 %v5330_v1  ;;  %4859 = vmatprep.mubr.msk.f32.mxu1 %vm5331_vm0, %v5330_v1 }
  0x48   : > { %4856 = vmatpush3.msra.mxu1 %v4432_v38  ;;  %4888 = vmatprep.subr.mxu0 %v5330_v1 }
  0x49   : > { %4857 = vmatprep.subr.mxu1 %v5330_v1  ;;  %4889 = vmatpush3.msra.mxu0 %v4453_v39 }
  0x4a   : > { %4858 = vmatpush3.msra.mxu1 %v4431_v40  ;;  %4890 = vmatprep.subr.mxu0 %v5330_v1 }
  0x4b   : > { %4860 = vmatmul.mubr.msk.f32.vlgmr.msra.gmra.mxu1 %vm547_vm1, %v5509_v8  ;;  %4873 = vmatprep.subr.mxu1 %v5330_v1 }
  0x4c   : > { %4874 = vmatpush3.msra.mxu1 %v4448_v41  ;;  %4891 = vmatpush3.msra.mxu0 %v4452_v42 }
  0x4d   : > { %4875 = vmatprep.subr.mxu1 %v5330_v1  ;;  %4892 = vmatprep.mubr.msk.f32.mxu0 %vm5331_vm0, %v5330_v1 }
  0x4e   : > { %4876 = vmatpush3.msra.mxu1 %v4447_v43  ;;  %4893 = vmatmul.mubr.msk.f32.vlgmr.msra.gmra.mxu0 %vm547_vm1, %v5509_v8 }
  0x4f   : > { %4877 = vmatprep.subr.mxu1 %v5330_v1  ;;  %4881 = vmatprep.mubr.msk.f32.mxu1 %vm5331_vm0, %v5330_v1 }
  0x50   : > { %4878 = vmatpush3.msra.mxu1 %v4446_v44  ;;  %4906 = vmatprep.subr.mxu0 %v5330_v1 }
  0x51   : > { %4879 = vmatprep.subr.mxu1 %v5330_v1  ;;  %4908 = vmatprep.mubr.msk.f32.mxu0 %vm5331_vm0, %v5330_v1 }
  0x52   : > { %4880 = vmatpush3.msra.mxu1 %v4445_v45 }
  0x53   : > { %4882 = vmatmul.mubr.msk.f32.vlgmr.msra.gmra.mxu1 %vm547_vm1, %v5509_v8  ;;  %4895 = vmatprep.subr.mxu1 %v5330_v1 }
  0x54   : > { %4903 = vmatprep.mubr.msk.f32.mxu1 %vm5331_vm0, %v5330_v1  ;;  %4896 = vmatpush3.msra.mxu1 %v4462_v46 }
  0x55   : > { %4897 = vmatprep.subr.mxu1 %v5330_v1 }
  0x56   : > { %4898 = vmatpush3.msra.mxu1 %v4461_v47 }
  0x57   : > { %4899 = vmatprep.subr.mxu1 %v5330_v1 }
  0x58   : > { %4900 = vmatpush3.msra.mxu1 %v4460_v48 }
  0x59   : > { %4901 = vmatprep.subr.mxu1 %v5330_v1 }
  0x5a   : > { %4902 = vmatpush3.msra.mxu1 %v4459_v49 }
  0x5b   : > { %4911 = vmatprep.subr.mxu1 %v5330_v1  ;;  %4904 = vmatmul.mubr.msk.f32.vlgmr.msra.gmra.mxu1 %vm547_vm1, %v5509_v8 }
  0x5c   : > { %4913 = vmatprep.mubr.msk.f32.mxu1 %vm5331_vm0, %v5330_v1 }
  0xe3   : > { %v617_v50 = vpop.f32.mrf.mxu1 }
  0xe4   : > { %v618_v61 = vadd.f32 %v4387_v57, %v617_v50 }
  0xe5   : > { %v4784_v51 = vpop.f32.mrf.mxu1 }
  0xe8   : > { %v949_v52 = vpop.f32.mrf.mxu0 }
  0xe9   : > { %v950_v60 = vadd.f32 %v4415_v56, %v949_v52 }
  0xea   : > { %v4828_v54 = vpop.f32.mrf.mxu0 }
  0xeb   : > { %v700_v55 = vpop.f32.mrf.mxu1 }
  0xec   : > { %v701_v58 = vadd.f32 %v4394_v53, %v700_v55 }
  0xed   : > { %v4795_v59 = vpop.f32.mrf.mxu1 }
  0xee   : > { %4907 = vmatpush3.xpose.msk.msra.mxu0 %vm1534_vm2, %v701_v58 }
  0xef   : > { %4916 = vmatprep.subr.mxu0 %v5330_v1 }
  0xf1   : > { %4909 = vmatmul.mubr.msk.f32.vlgmr.msra.gmra.mxu0 %vm1534_vm2, %v618_v61 }
  0xf2   : > { %4917 = vmatpush3.xpose.msk.msra.mxu0 %vm1534_vm2, %v950_v60  ;;  %4918 = vmatprep.mubr.msk.f32.mxu0 %vm5331_vm0, %v5330_v1 }
  0xf3   : > { %v783_v63 = vpop.f32.mrf.mxu1  ;;  %4926 = vmatprep.subr.mxu0 %v5330_v1 }
  0xf4   : > { %v784_v0 = vadd.f32 %v4401_v62, %v783_v63  ;;  %v4422_v63 = vld [vmem:[%s6362_s3 + $0x9] ss:$0 sm:$0xff] }
  0xf5   : > { %v4806_v2 = vpop.f32.mrf.mxu1 }
  0xf6   : > { %4912 = vmatpush3.msra.mxu1 %v784_v0  ;;  %v1115_v3 = vpop.f32.mrf.mxu0 }
  0xf7   : > { %4921 = vmatprep.subr.mxu1 %v5330_v1  ;;  %v1116_v21 = vadd.f32 %v4429_v16, %v1115_v3 }
  0xf8   : > { %v4850_v4 = vpop.f32.mrf.mxu0 }
  0xfb   : > { %v866_v6 = vpop.f32.mrf.mxu1 }
  0xfc   : > { %v867_v7 = vadd.f32 %v4408_v5, %v866_v6  ;;  %v4443_v5 = vld [vmem:[%s6362_s3 + $0xa] ss:$0 sm:$0xff] }
  0xfd   : > { %v4817_v9 = vpop.f32.mrf.mxu1 }
  0xfe   : > { %4919 = vmatmul.mubr.msk.f32.vlgmr.msra.gmra.mxu0 %vm1534_vm2, %v867_v7 }
  0xff   : > { %4928 = vmatprep.mubr.msk.f32.mxu0 %vm5331_vm0, %v5330_v1 }
 0x102   : > { %v5753_v10 = vpop.f32.mrf.mxu0 }
 0x103   : > { %v5755_v11 = vpop.f32.mrf.mxu1  ;;  %v1282_v9 = vadd.f32 %v4443_v5, %v5753_v10 }
 0x104   : > { %v4872_v12 = vpop.f32.mrf.mxu0  ;;  %v1033_v4 = vadd.f32 %v4422_v63, %v5755_v11 }
 0x105   : > { %v4839_v13 = vpop.f32.mrf.mxu1 }
 0x106   : > { %v4464_v13 = vld [vmem:[%s6362_s3 + $0xb] ss:$0 sm:$0xff] }
 0x10b   : > { %v1198_v15 = vpop.f32.mrf.mxu1 }
 0x10c   : > { %v1199_v17 = vadd.f32 %v4436_v14, %v1198_v15 }
 0x10d   : > { %v4861_v19 = vpop.f32.mrf.mxu1 }
 0x10e   : > { %v1447_v20 = vpop.f32.mrf.mxu0  ;;  %4927 = vmatpush3.xpose.msk.msra.mxu0 %vm1534_vm2, %v1199_v17  ;;  %v2195_v19 = vld [vmem:[%s6363_s4 + $0x18] sm:$0xff] }
 0x10f   : > { %v1448_v22 = vadd.f32 %v4457_v18, %v1447_v20  ;;  %4936 = vmatprep.subr.mxu0 %v5330_v1 }
 0x110   : > { %v4894_v23 = vpop.f32.mrf.mxu0 }
 0x111   : > { %4929 = vmatmul.mubr.msk.f32.vlgmr.msra.gmra.mxu0 %vm1534_vm2, %v1116_v21  ;;  %v2194_v23 = vld [vmem:[%s6363_s4 + $0x10] sm:$0xff] }
 0x112   : > { %4937 = vmatpush3.xpose.msk.msra.mxu0 %vm1534_vm2, %v1448_v22  ;;  %4938 = vmatprep.mubr.msk.f32.mxu0 %vm5331_vm0, %v5330_v1 }
 0x113   : > { %v1364_v25 = vpop.f32.mrf.mxu1  ;;  %4946 = vmatprep.subr.mxu0 %v5330_v1 }
 0x114   : > { %v1365_v26 = vadd.f32 %v4450_v24, %v1364_v25  ;;  %v2193_v24 = vld [vmem:[%s6363_s4 + $0x8] sm:$0xff]  ;;  %v2192_v25 = vld [vmem:[%s6363_s4] sm:$0xff] }
 0x115   : > { %v4883_v27 = vpop.f32.mrf.mxu1 }
 0x116   : > { %4939 = vmatmul.mubr.msk.f32.vlgmr.msra.gmra.mxu0 %vm1534_vm2, %v1365_v26 }
 0x117   : > { %4954 = vmatprep.mubr.msk.f32.mxu0 %vm5331_vm0, %v5330_v1  ;;  %4947 = vmatpush3.msra.mxu0 %v2195_v19  ;;  %v4528_v19 = vld [vmem:[%s6365_s6 + $0xd0] sm:$0xff] }
 0x118   : > { %4948 = vmatprep.subr.mxu0 %v5330_v1 }
 0x119   : > { %4949 = vmatpush3.msra.mxu0 %v2194_v23  ;;  %v4526_v23 = vld [vmem:[%s6365_s6 + $0xc0] sm:$0xff] }
 0x11a   : > { %4950 = vmatprep.subr.mxu0 %v5330_v1 }
 0x11b   : > { %v1530_v60 = vpop.f32.mrf.mxu1  ;;  %4951 = vmatpush3.msra.mxu0 %v2193_v24  ;;  %v4522_v24 = vld [vmem:[%s6365_s6 + $0x58] sm:$0xff] }
 0x11c   : > { %v1531_v15 = vadd.f32 %v4464_v13, %v1530_v60  ;;  %4952 = vmatprep.subr.mxu0 %v5330_v1  ;;  %v4492_v13 = vld [vmem:[%s6365_s6 + $0x108] sm:$0xff] }
 0x11d   : > { %v4905_v61 = vpop.f32.mrf.mxu1  ;;  %4953 = vmatpush3.msra.mxu0 %v2192_v25  ;;  %v4543_v25 = vld [vmem:[%s6365_s6 + $0x78] sm:$0xff] }
 0x11e   : > { %4968 = vmatprep.subr.mxu0 %v5330_v1 }
 0x1b1   : > { %v1607_v28 = vpop.f32.mrf.mxu0 }
 0x1b2   : > { %v1611_v29 = vsel %vm1534_vm2, %v1607_v28, -inf }
 0x1b3   : > { %1612 = vmax.xlane.f32.xlu0 %v1611_v29  ;;  %v4910_v30 = vpop.f32.mrf.mxu0 }
 0x1be   : > { %v1767_v31 = vpop.f32.mrf.mxu0 }
 0x1bf   : > { %v1771_v32 = vsel %vm1534_vm2, %v1767_v31, -inf }
 0x1c0   : > { %1772 = vmax.xlane.f32.xlu0 %v1771_v32  ;;  %v4920_v33 = vpop.f32.mrf.mxu0 }
 0x1d1   : > { %v1927_v34 = vpop.f32.mrf.mxu0 }
 0x1d2   : > { %v1931_v35 = vsel %vm1534_vm2, %v1927_v34, -inf }
 0x1d3   : > { %1932 = vmax.xlane.f32.xlu1 %v1931_v35  ;;  %v4930_v36 = vpop.f32.mrf.mxu0 }
 0x1d4   : > { %v4478_v36 = vld [vmem:[%s6364_s5] ss:$0 sm:$0xff] }
 0x1d6   : > { %v2087_v37 = vpop.f32.mrf.mxu0 }
 0x1d7   : > { %v2091_v38 = vsel %vm1534_vm2, %v2087_v37, -inf }
 0x1d8   : > { %2092 = vmax.xlane.f32.xlu1 %v2091_v38  ;;  %v4940_v39 = vpop.f32.mrf.mxu0 }
 0x23c   : > { %v1613_v40 = vpop.xlane.xlu0 %1612 }
 0x23d   : > { %v1614_v41 = vsub.f32 %v1607_v28, %v1613_v40 }
 0x23f   : > { %v1615_v42 = vmul.f32 1.442695, %v1614_v41 }
 0x241   : > { %5230 = vpow2.f32 %v1615_v42 }
 0x249   : > { %v1773_v43 = vpop.xlane.xlu0 %1772 }
 0x24a   : > { %v1774_v44 = vsub.f32 %v1767_v31, %v1773_v43 }
 0x24c   : > { %v1775_v45 = vmul.f32 1.442695, %v1774_v44  ;;  %v4487_v44 = vld [vmem:[%s6365_s6 + $0x98] sm:$0xff] }
 0x24e   : > { %v5231_v46 = vpop.eup %5230  ;;  %5232 = vpow2.f32 %v1775_v45  ;;  %v4486_v45 = vld [vmem:[%s6365_s6 + $0x90] sm:$0xff] }
 0x24f   : > { %v1617_v47 = vsel %vm1534_vm2, %v5231_v46, 0.0 }
 0x250   : > { %1618 = vadd.xlane.f32.xlu0 %v1617_v47  ;;  %v2311_v47 = vld [vmem:[%s6365_s6 + $0x10] sm:$0xff] }
 0x25b   : > { %v5233_v48 = vpop.eup %5232 }
 0x25c   : > { %v1933_v49 = vpop.xlane.xlu1 %1932  ;;  %v1777_v50 = vsel %vm1534_vm2, %v5233_v48, 0.0 }
 0x25d   : > { %v1934_v51 = vsub.f32 %v1927_v34, %v1933_v49  ;;  %1778 = vadd.xlane.f32.xlu1 %v1777_v50  ;;  %v4484_v49 = vld [vmem:[%s6365_s6 + $0x80] sm:$0xff] }
 0x25e   : > { %v5873_v50 = vld [vmem:[%s533_s27] sm:$0xff]  ;;  %s5335_s27 = smov [#allocation2]  }
 0x25f   : > { %v1935_v52 = vmul.f32 1.442695, %v1934_v51  ;;  %v4501_v51 = vld [vmem:[%s6365_s6 + $0x38] sm:$0xff]  ;;  %s5272_s21 = sshll.u32 %s5335_s27, 4  ;;  %s5273_s21 = int_to_ptr.vmem [resolvable:$false] %s5272_s21 }
 0x261   : > { %5234 = vpow2.f32 %v1935_v52  ;;  %v2093_v53 = vpop.xlane.xlu1 %2092  ;;  %v2309_v52 = vld [vmem:[%s6365_s6] sm:$0xff] }
 0x262   : > { %v2094_v54 = vsub.f32 %v2087_v37, %v2093_v53  ;;  %v4500_v53 = vld [vmem:[%s6365_s6 + $0x30] sm:$0xff] }
 0x264   : > { %v2095_v55 = vmul.f32 1.442695, %v2094_v54  ;;  %v4499_v54 = vld [vmem:[%s6365_s6 + $0x28] sm:$0xff] }
 0x266   : > { %5236 = vpow2.f32 %v2095_v55  ;;  %v4498_v55 = vld [vmem:[%s6365_s6 + $0x20] sm:$0xff] }
 0x26e   : > { %v5235_v56 = vpop.eup %5234 }
 0x26f   : > { %v1937_v57 = vsel %vm1534_vm2, %v5235_v56, 0.0 }
 0x270   : > { %1938 = vadd.xlane.f32.xlu0 %v1937_v57 }
 0x273   : > { %v5237_v58 = vpop.eup %5236 }
 0x274   : > { %v2097_v59 = vsel %vm1534_vm2, %v5237_v58, 0.0 }
 0x275   : > { %2098 = vadd.xlane.f32.xlu1 %v2097_v59 }
 0x2d9   : > { %v1619_v62 = vpop.xlane.xlu0 %1618 }
 0x2da   : > { %5238 = vrcp.f32 %v1619_v62 }
 0x2e6   : > { %v1779_v0 = vpop.xlane.xlu1 %1778 }
 0x2e7   : > { %v5239_v2 = vpop.eup %5238  ;;  %5240 = vrcp.f32 %v1779_v0 }
 0x2e8   : > { %v1621_v3 = vmul.f32 %v5239_v2, %v5231_v46  ;;  %v4485_v46 = vld [vmem:[%s6365_s6 + $0x88] sm:$0xff]  ;;  %v4480_v2 = vld [vmem:[%s6373_s14] ss:$0 sm:$0xff] }
 0x2ea   : > { %4914 = vmatmul.mubr.msk.f32.vlgmr.msra.gmra.mxu1 %vm1534_vm2, %v1621_v3 }
 0x2eb   : > { %4922 = vmatpush3.msra.mxu1 %v1033_v4  ;;  %4923 = vmatprep.mubr.msk.f32.mxu1 %vm5331_vm0, %v5330_v1  ;;  %v4481_v4 = vld [vmem:[%s6374_s15] ss:$0 sm:$0xff] }
 0x2ec   : > { %4931 = vmatprep.subr.mxu1 %v5330_v1 }
 0x2f4   : > { %v5241_v6 = vpop.eup %5240 }
 0x2f5   : > { %v1781_v7 = vmul.f32 %v5241_v6, %v5233_v48  ;;  %v2310_v48 = vld [vmem:[%s6365_s6 + $0x8] sm:$0xff] }
 0x2f7   : > { %4924 = vmatmul.mubr.msk.f32.vlgmr.msra.gmra.mxu1 %vm1534_vm2, %v1781_v7  ;;  %v4494_v7 = vld [vmem:[%s6365_s6 + $0x118] sm:$0xff] }
 0x2f8   : > { %4932 = vmatpush3.msra.mxu1 %v1282_v9  ;;  %4933 = vmatprep.mubr.msk.f32.mxu1 %vm5331_vm0, %v5330_v1  ;;  %v4515_v9 = vld [vmem:[%s6365_s6 + $0x138] sm:$0xff] }
 0x2f9   : > { %v1939_v11 = vpop.xlane.xlu0 %1938  ;;  %4941 = vmatprep.subr.mxu1 %v5330_v1 }
 0x2fa   : > { %5242 = vrcp.f32 %v1939_v11  ;;  %v4493_v11 = vld [vmem:[%s6365_s6 + $0x110] sm:$0xff] }
 0x2fe   : > { %v2099_v12 = vpop.xlane.xlu1 %2098 }
 0x2ff   : > { %5244 = vrcp.f32 %v2099_v12  ;;  %v4514_v12 = vld [vmem:[%s6365_s6 + $0x130] sm:$0xff] }
 0x307   : > { %v5243_v14 = vpop.eup %5242 }
 0x308   : > { %v1941_v16 = vmul.f32 %v5243_v14, %v5235_v56  ;;  %v4513_v14 = vld [vmem:[%s6365_s6 + $0x128] sm:$0xff] }
 0x30a   : > { %4934 = vmatmul.mubr.msk.f32.vlgmr.msra.gmra.mxu1 %vm1534_vm2, %v1941_v16  ;;  %v4512_v16 = vld [vmem:[%s6365_s6 + $0x120] sm:$0xff] }
 0x30b   : > { %4942 = vmatpush3.msra.mxu1 %v1531_v15  ;;  %4943 = vmatprep.mubr.msk.f32.mxu1 %vm5331_vm0, %v5330_v1  ;;  %v4491_v15 = vld [vmem:[%s6365_s6 + $0x100] sm:$0xff] }
 0x30c   : > { %v5245_v10 = vpop.eup %5244  ;;  %4957 = vmatprep.subr.mxu1 %v5330_v1 }
 0x30d   : > { %v2101_v17 = vmul.f32 %v5245_v10, %v5237_v58  ;;  %v4508_v10 = vld [vmem:[%s6365_s6 + $0xb8] sm:$0xff] }
 0x30f   : > { %4944 = vmatmul.mubr.msk.f32.vlgmr.msra.gmra.mxu1 %vm1534_vm2, %v2101_v17  ;;  %v4529_v17 = vld [vmem:[%s6365_s6 + $0xd8] sm:$0xff] }
 0x310   : > { %4965 = vmatprep.mubr.msk.f32.mxu1 %vm5331_vm0, %v5330_v1 }
 0x3aa   : > { %v1691_v18 = vpop.f32.mrf.mxu1 }
 0x3ac   : > { %v4915_v20 = vpop.f32.mrf.mxu1 }
 0x3ad   : > { %v4506_v20 = vld [vmem:[%s6365_s6 + $0xa8] sm:$0xff] }
 0x3b7   : > { %v1851_v21 = vpop.f32.mrf.mxu1 }
 0x3b8   : > { %2176 = vrot.lane.b32.xlu0 %v1851_v21, %s6384_s19  ;;  %v4527_v21 = vld [vmem:[%s6365_s6 + $0xc8] sm:$0xff] }
 0x3b9   : > { %v4925_v22 = vpop.f32.mrf.mxu1 }
 0x3ba   : > { %v4505_v22 = vld [vmem:[%s6365_s6 + $0xa0] sm:$0xff] }
 0x3ca   : > { %v2011_v26 = vpop.f32.mrf.mxu1 }
 0x3cb   : > { %2180 = vrot.lane.b32.xlu1 %v2011_v26, %s6383_s17  ;;  %v4521_v26 = vld [vmem:[%s6365_s6 + $0x50] sm:$0xff]  ;;  %s523_s17 = sand.u32 1, %s5320_s22  }
 0x3cc   : > { %v4935_v27 = vpop.f32.mrf.mxu1  ;;  %s4384_s20 = sshll.u32 %s523_s17, 3  ;;  %s4296_s1 = scalar_lea.sflag [#allocation3], %s523_s17 }
 0x3cd   : > { %v4542_v27 = vld [vmem:[%s6365_s6 + $0x70] sm:$0xff] }
 0x3cf   : > { %v2171_v28 = vpop.f32.mrf.mxu1 }
 0x3d0   : > { %2184 = vrot.lane.b32.xlu1 %v2171_v28, %s6382_s29  ;;  %v4520_v28 = vld [vmem:[%s6365_s6 + $0x48] sm:$0xff]  ;;  %s525_s29 = scalar_lea.vmem [#allocation2], %s4384_s20 }
 0x3d1   : > { %v4945_v29 = vpop.f32.mrf.mxu1  ;;  %s4309_s18 = sshll.u32 %s525_s29, 4  ;;  %s4310_s18 = int_to_ptr.vmem [resolvable:$true] %s4309_s18 }
 0x3d2   : > { %v4541_v29 = vld [vmem:[%s6365_s6 + $0x68] sm:$0xff]  ;;  %s5268_s23 = scalar_lea.vmem %s4310_s18, 128  ;;  %p5275_p0 = scmp.lt.s32.totalorder %s4310_s18, %s5273_s21 }
 0x3d3   : > { %p5269_p11 = scmp.ne.s32.totalorder %s4310_s18, %s5268_s23 }
 0x3d5   : > { %p5270_p12 = pnand %p5269_p11, %p5459_p5 }
 0x3d7   : > { %p5271_p13 = pneg %p5270_p12 }
 0x42a   : > { %v2177_v31 = vpop.permute.xlu0 %2176 }
 0x42b   : > { %v2187_v32 = vsel %vm1534_vm2, %v1691_v18, %v2177_v31  ;;  %v4507_v18 = vld [vmem:[%s6365_s6 + $0xb0] sm:$0xff]  ;;  %v4540_v31 = vld [vmem:[%s6365_s6 + $0x60] sm:$0xff] }
 0x43d   : > { %v2181_v30 = vpop.permute.xlu1 %2180 }
 0x43e   : > { %v2189_v33 = vsel %vm2188_vm3, %v2187_v32, %v2181_v30  ;;  %v4519_v30 = vld [vmem:[%s6365_s6 + $0x40] sm:$0xff]  ;;  %v4536_v32 = vld [vmem:[%s6365_s6 + $0x158] sm:$0xff] }
 0x442   : > { %v2185_v34 = vpop.permute.xlu1 %2184 }
 0x443   : > { %v2191_v35 = vsel %vm2190_vm4, %v2189_v33, %v2185_v34  ;;  %v4535_v33 = vld [vmem:[%s6365_s6 + $0x150] sm:$0xff]  ;;  %v4534_v34 = vld [vmem:[%s6365_s6 + $0x148] sm:$0xff] }
 0x444   : > { %4955 = vmatmul.mubr.msk.f32.vlgmr.msra.gmra.mxu0 %vm547_vm1, %v2191_v35  ;;  %v4533_v35 = vld [vmem:[%s6365_s6 + $0x140] sm:$0xff] }
 0x445   : > { %4976 = vmatprep.mubr.msk.f32.mxu0 %vm5331_vm0, %v5330_v1  ;;  %4969 = vmatpush3.msra.mxu0 %v4487_v44  ;;  %v4557_v44 = vld [vmem:[%s6365_s6 + $0x178] sm:$0xff] }
 0x446   : > { %4970 = vmatprep.subr.mxu0 %v5330_v1 }
 0x447   : > { %4971 = vmatpush3.msra.mxu0 %v4486_v45  ;;  %v4556_v45 = vld [vmem:[%s6365_s6 + $0x170] sm:$0xff] }
 0x448   : > { %4972 = vmatprep.subr.mxu0 %v5330_v1 }
 0x449   : > { %4973 = vmatpush3.msra.mxu0 %v4485_v46  ;;  %v4554_v46 = vld [vmem:[%s6365_s6 + $0x160] sm:$0xff] }
 0x44a   : > { %4974 = vmatprep.subr.mxu0 %v5330_v1 }
 0x44b   : > { %4975 = vmatpush3.msra.mxu0 %v4484_v49 }
 0x44c   : > { %4990 = vmatprep.subr.mxu0 %v5330_v1  ;;  %4977 = vmatmul.mubr.msk.f32.vlgmr.msra.gmra.mxu0 %vm547_vm1, %v5873_v50 }
 0x44d   : > { %4991 = vmatpush3.msra.mxu0 %v4501_v51  ;;  %4998 = vmatprep.mubr.msk.f32.mxu0 %vm5331_vm0, %v5330_v1 }
 0x44e   : > { %4992 = vmatprep.subr.mxu0 %v5330_v1 }
 0x44f   : > { %4993 = vmatpush3.msra.mxu0 %v4500_v53 }
 0x450   : > { %4994 = vmatprep.subr.mxu0 %v5330_v1 }
 0x451   : > { %4995 = vmatpush3.msra.mxu0 %v4499_v54 }
 0x452   : > { %4996 = vmatprep.subr.mxu0 %v5330_v1 }
 0x453   : > { %4997 = vmatpush3.msra.mxu0 %v4498_v55 }
 0x454   : > { %5012 = vmatprep.subr.mxu0 %v5330_v1 }
 0x504   : > { %v2272_v37 = vpop.f32.mrf.mxu0 }
 0x505   : > { %v2273_v38 = vadd.f32 %v4478_v36, %v2272_v37  ;;  %v4550_v36 = vld [vmem:[%s6365_s6 + $0xf8] sm:$0xff]  ;;  %v4549_v37 = vld [vmem:[%s6365_s6 + $0xf0] sm:$0xff] }
 0x506   : > { %v4956_v39 = vpop.f32.mrf.mxu0 }
 0x507   : > { %v2276_v40 = vadd.f32 %v2273_v38, %v5509_v8  ;;  %v2312_v8 = vld [vmem:[%s6365_s6 + $0x18] sm:$0xff]  ;;  %v4548_v38 = vld [vmem:[%s6365_s6 + $0xe8] sm:$0xff]  ;;  %v4547_v39 = vld [vmem:[%s6365_s6 + $0xe0] sm:$0xff] }
 0x508   : > { %4958 = vmatpush3.msra.mxu1 %v2312_v8  ;;  %v4555_v8 = vld [vmem:[%s6365_s6 + $0x168] sm:$0xff] }
 0x509   : > { %v2277_v41 = vsel %vm547_vm1, %v2276_v40, 0.0  ;;  %v2282_v42 = vmul.f32 %v2276_v40, %v2276_v40  ;;  %4959 = vmatprep.subr.mxu1 %v5330_v1 }
 0x50a   : > { %2278 = vadd.xlane.f32.xlu1 %v2277_v41  ;;  %4960 = vmatpush3.msra.mxu1 %v2311_v47  ;;  %v4482_v47 = vld [vmem:[%s6366_s7] ss:$0 sm:$0xff] }
 0x50b   : > { %v2283_v43 = vsel %vm547_vm1, %v2282_v42, 0.0  ;;  %4961 = vmatprep.subr.mxu1 %v5330_v1 }
 0x50c   : > { %2284 = vadd.xlane.f32.xlu0 %v2283_v43  ;;  %4962 = vmatpush3.msra.mxu1 %v2310_v48  ;;  %v2475_v41 = vpop.f32.mrf.mxu0 }
 0x50d   : > { %4963 = vmatprep.subr.mxu1 %v5330_v1 }
 0x50e   : > { %4964 = vmatpush3.msra.mxu1 %v2309_v52  ;;  %v4978_v43 = vpop.f32.mrf.mxu0 }
 0x50f   : > { %4979 = vmatprep.subr.mxu1 %v5330_v1 }
 0x593   : > { %v2279_v56 = vpop.xlane.xlu1 %2278 }
 0x594   : > { %v2281_v57 = vmul.f32 0.03125, %v2279_v56 }
 0x595   : > { %v2285_v58 = vpop.xlane.xlu0 %2284 }
 0x596   : > { %v2287_v59 = vmul.f32 %v2281_v57, %v2281_v57  ;;  %v2286_v60 = vmul.f32 0.03125, %v2285_v58  ;;  %v2289_v63 = vsub.f32 %v2276_v40, %v2281_v57  ;;  %v4489_v40 = vld [vmem:[%s6366_s7 + $0x4] ss:$0 sm:$0xff] }
 0x597   : > { %v2476_v42 = vadd.f32 %v4489_v40, %v2475_v41 }
 0x598   : > { %v2288_v61 = vsub.f32 %v2286_v60, %v2287_v59  ;;  %v4510_v59 = vld [vmem:[%s6366_s7 + $0x5] ss:$0 sm:$0xff] }
 0x59a   : > { %v2290_v62 = vadd.f32 1e-05, %v2288_v61  ;;  %v4503_v61 = vld [vmem:[%s6366_s7 + $0x1] ss:$0 sm:$0xff] }
 0x59c   : > { %5246 = vrsqrt.f32 %v2290_v62 }
 0x5a9   : > { %v5247_v0 = vpop.eup %5246 }
 0x5aa   : > { %v2292_v3 = vmul.f32 %v5247_v0, %v2289_v63  ;;  %v4531_v63 = vld [vmem:[%s6366_s7 + $0x6] ss:$0 sm:$0xff] }
 0x5ac   : > { %v2300_v5 = vmul.f32 %v4480_v2, %v2292_v3 }
 0x5ae   : > { %v5909_v6 = vadd.f32 %v4481_v4, %v2300_v5 }
 0x5b0   : > { %4966 = vmatmul.mubr.msk.f32.vlgmr.msra.gmra.mxu1 %vm547_vm1, %v5909_v6  ;;  %4999 = vmatmul.mubr.msk.f32.vlgmr.msra.gmra.mxu0 %vm547_vm1, %v5909_v6 }
 0x5b1   : > { %4980 = vmatpush3.msra.mxu1 %v4494_v7  ;;  %5013 = vmatpush3.msra.mxu0 %v4515_v9  ;;  %v4524_v7 = vld [vmem:[%s6366_s7 + $0x2] ss:$0 sm:$0xff] }
 0x5b2   : > { %4981 = vmatprep.subr.mxu1 %v5330_v1  ;;  %5014 = vmatprep.subr.mxu0 %v5330_v1 }
 0x5b3   : > { %4982 = vmatpush3.msra.mxu1 %v4493_v11  ;;  %5015 = vmatpush3.msra.mxu0 %v4514_v12 }
 0x5b4   : > { %4983 = vmatprep.subr.mxu1 %v5330_v1  ;;  %5016 = vmatprep.subr.mxu0 %v5330_v1 }
 0x5b5   : > { %4984 = vmatpush3.msra.mxu1 %v4492_v13  ;;  %5017 = vmatpush3.msra.mxu0 %v4513_v14 }
 0x5b6   : > { %4985 = vmatprep.subr.mxu1 %v5330_v1  ;;  %5018 = vmatprep.subr.mxu0 %v5330_v1 }
 0x5b7   : > { %4986 = vmatpush3.msra.mxu1 %v4491_v15  ;;  %4987 = vmatprep.mubr.msk.f32.mxu1 %vm5331_vm0, %v5330_v1 }
 0x5b8   : > { %5019 = vmatpush3.msra.mxu0 %v4512_v16  ;;  %4988 = vmatmul.mubr.msk.f32.vlgmr.msra.gmra.mxu1 %vm547_vm1, %v5873_v50 }
 0x5b9   : > { %5001 = vmatprep.subr.mxu1 %v5330_v1  ;;  %5020 = vmatprep.mubr.msk.f32.mxu0 %vm5331_vm0, %v5330_v1 }
 0x5ba   : > { %5034 = vmatprep.subr.mxu0 %v5330_v1  ;;  %5002 = vmatpush3.msra.mxu1 %v4508_v10  ;;  %v4552_v10 = vld [vmem:[%s6366_s7 + $0x7] ss:$0 sm:$0xff] }
 0x5bb   : > { %5021 = vmatmul.mubr.msk.f32.vlgmr.msra.gmra.mxu0 %vm547_vm1, %v5873_v50  ;;  %5003 = vmatprep.subr.mxu1 %v5330_v1 }
 0x5bc   : > { %5035 = vmatpush3.msra.mxu0 %v4529_v17  ;;  %5004 = vmatpush3.msra.mxu1 %v4507_v18  ;;  %v4545_v18 = vld [vmem:[%s6366_s7 + $0x3] ss:$0 sm:$0xff] }
 0x5bd   : > { %5036 = vmatprep.subr.mxu0 %v5330_v1  ;;  %5005 = vmatprep.subr.mxu1 %v5330_v1 }
 0x5be   : > { %5037 = vmatpush3.msra.mxu0 %v4528_v19  ;;  %5006 = vmatpush3.msra.mxu1 %v4506_v20 }
 0x5bf   : > { %5038 = vmatprep.subr.mxu0 %v5330_v1  ;;  %5007 = vmatprep.subr.mxu1 %v5330_v1 }
 0x5c0   : > { %5039 = vmatpush3.msra.mxu0 %v4527_v21  ;;  %5008 = vmatpush3.msra.mxu1 %v4505_v22 }
 0x5c1   : > { %5040 = vmatprep.subr.mxu0 %v5330_v1  ;;  %5009 = vmatprep.mubr.msk.f32.mxu1 %vm5331_vm0, %v5330_v1 }
 0x5c2   : > { %5041 = vmatpush3.msra.mxu0 %v4526_v23  ;;  %5010 = vmatmul.mubr.msk.f32.vlgmr.msra.gmra.mxu1 %vm547_vm1, %v5873_v50 }
 0x5c3   : > { %5023 = vmatprep.subr.mxu1 %v5330_v1  ;;  %5042 = vmatprep.mubr.msk.f32.mxu0 %vm5331_vm0, %v5330_v1 }
 0x5c4   : > { %5056 = vmatprep.subr.mxu0 %v5330_v1  ;;  %5024 = vmatpush3.msra.mxu1 %v4522_v24 }
 0x5c5   : > { %5043 = vmatmul.mubr.msk.f32.vlgmr.msra.gmra.mxu0 %vm547_vm1, %v5873_v50  ;;  %5025 = vmatprep.subr.mxu1 %v5330_v1 }
 0x5c6   : > { %5057 = vmatpush3.msra.mxu0 %v4543_v25  ;;  %5026 = vmatpush3.msra.mxu1 %v4521_v26 }
 0x5c7   : > { %5058 = vmatprep.subr.mxu0 %v5330_v1  ;;  %5027 = vmatprep.subr.mxu1 %v5330_v1 }
 0x5c8   : > { %5059 = vmatpush3.msra.mxu0 %v4542_v27  ;;  %5028 = vmatpush3.msra.mxu1 %v4520_v28 }
 0x5c9   : > { %5060 = vmatprep.subr.mxu0 %v5330_v1  ;;  %5029 = vmatprep.subr.mxu1 %v5330_v1 }
 0x5ca   : > { %5061 = vmatpush3.msra.mxu0 %v4541_v29  ;;  %5030 = vmatpush3.msra.mxu1 %v4519_v30 }
 0x5cb   : > { %5062 = vmatprep.subr.mxu0 %v5330_v1  ;;  %5031 = vmatprep.mubr.msk.f32.mxu1 %vm5331_vm0, %v5330_v1 }
 0x5cc   : > { %5063 = vmatpush3.msra.mxu0 %v4540_v31  ;;  %5064 = vmatprep.mubr.msk.f32.mxu0 %vm5331_vm0, %v5330_v1 }
 0x5cd   : > { %5032 = vmatmul.mubr.msk.f32.vlgmr.msra.gmra.mxu1 %vm547_vm1, %v5909_v6  ;;  %5045 = vmatprep.subr.mxu1 %v5330_v1 }
 0x5ce   : > { %5065 = vmatmul.mubr.msk.f32.vlgmr.msra.gmra.mxu0 %vm547_vm1, %v5909_v6  ;;  %5046 = vmatpush3.msra.mxu1 %v4536_v32 }
 0x5cf   : > { %5047 = vmatprep.subr.mxu1 %v5330_v1  ;;  %5053 = vmatprep.mubr.msk.f32.mxu1 %vm5331_vm0, %v5330_v1 }
 0x5d0   : > { %5048 = vmatpush3.msra.mxu1 %v4535_v33  ;;  %5078 = vmatprep.subr.mxu0 %v5330_v1 }
 0x5d1   : > { %5049 = vmatprep.subr.mxu1 %v5330_v1  ;;  %5086 = vmatprep.mubr.msk.f32.mxu0 %vm5331_vm0, %v5330_v1 }
 0x5d2   : > { %5050 = vmatpush3.msra.mxu1 %v4534_v34  ;;  %5079 = vmatpush3.msra.mxu0 %v4557_v44 }
 0x5d3   : > { %5051 = vmatprep.subr.mxu1 %v5330_v1  ;;  %5080 = vmatprep.subr.mxu0 %v5330_v1 }
 0x5d4   : > { %5052 = vmatpush3.msra.mxu1 %v4533_v35  ;;  %5081 = vmatpush3.msra.mxu0 %v4556_v45 }
 0x5d5   : > { %5054 = vmatmul.mubr.msk.f32.vlgmr.msra.gmra.mxu1 %vm547_vm1, %v5873_v50  ;;  %5067 = vmatprep.subr.mxu1 %v5330_v1 }
 0x5d6   : > { %5068 = vmatpush3.msra.mxu1 %v4550_v36  ;;  %5075 = vmatprep.mubr.msk.f32.mxu1 %vm5331_vm0, %v5330_v1 }
 0x5d7   : > { %5069 = vmatprep.subr.mxu1 %v5330_v1  ;;  %5082 = vmatprep.subr.mxu0 %v5330_v1 }
 0x5d8   : > { %5070 = vmatpush3.msra.mxu1 %v4549_v37  ;;  %5083 = vmatpush3.msra.mxu0 %v4555_v8 }
 0x5d9   : > { %5071 = vmatprep.subr.mxu1 %v5330_v1  ;;  %5084 = vmatprep.subr.mxu0 %v5330_v1 }
 0x5da   : > { %5072 = vmatpush3.msra.mxu1 %v4548_v38  ;;  %5085 = vmatpush3.msra.mxu0 %v4554_v46 }
 0x5db   : > { %5073 = vmatprep.subr.mxu1 %v5330_v1  ;;  %5087 = vmatmul.mubr.msk.f32.vlgmr.msra.gmra.mxu0 %vm547_vm1, %v5873_v50 }
 0x5dc   : > { %5074 = vmatpush3.msra.mxu1 %v4547_v39  ;;  %5099 = vmatprep.subr.mxu0 %v5330_v1 }
 0x5dd   : > { %5076 = vmatmul.mubr.msk.f32.vlgmr.msra.gmra.mxu1 %vm547_vm1, %v5873_v50  ;;  %5089 = vmatprep.subr.mxu1 %v5330_v1  ;;  %v4496_v50 = vld [vmem:[%s6366_s7 + $0x8] ss:$0 sm:$0xff] }
 0x5de   : > { %5091 = vmatprep.mubr.msk.f32.mxu1 %vm5331_vm0, %v5330_v1  ;;  %5090 = vmatpush3.xpose.msk.msra.mxu1 %vm1534_vm2, %v2476_v42 }
 0x5df   : > { %5094 = vmatprep.subr.mxu1 %v5330_v1  ;;  %5101 = vmatprep.mubr.msk.f32.mxu0 %vm5331_vm0, %v5330_v1 }
 0x670   : > { %v2389_v48 = vpop.f32.mrf.mxu1  ;;  %v2641_v49 = vpop.f32.mrf.mxu0 }
 0x671   : > { %v2390_v51 = vadd.f32 %v4482_v47, %v2389_v48  ;;  %v2642_v3 = vadd.f32 %v4503_v61, %v2641_v49 }
 0x672   : > { %v4967_v52 = vpop.f32.mrf.mxu1  ;;  %v5000_v53 = vpop.f32.mrf.mxu0 }
 0x673   : > { %5092 = vmatmul.mubr.msk.f32.vlgmr.msra.gmra.mxu1 %vm1534_vm2, %v2390_v51 }
 0x674   : > { %5096 = vmatprep.mubr.msk.f32.mxu1 %vm5331_vm0, %v5330_v1 }
 0x678   : > { %v2558_v54 = vpop.f32.mrf.mxu1 }
 0x679   : > { %v2559_v55 = vadd.f32 %v4496_v50, %v2558_v54 }
 0x67a   : > { %v4989_v56 = vpop.f32.mrf.mxu1 }
 0x67b   : > { %5095 = vmatpush3.msra.mxu1 %v2559_v55  ;;  %v6113_v57 = vpop.f32.mrf.mxu0  ;;  %v4517_v56 = vld [vmem:[%s6366_s7 + $0x9] ss:$0 sm:$0xff] }
 0x67c   : > { %5104 = vmatprep.subr.mxu1 %v5330_v1 }
 0x67d   : > { %v5022_v58 = vpop.f32.mrf.mxu0 }
 0x682   : > { %v2724_v60 = vpop.f32.mrf.mxu1 }
 0x683   : > { %v2725_v62 = vadd.f32 %v4510_v59, %v2724_v60  ;;  %v2808_v60 = vadd.f32 %v4517_v56, %v6113_v57 }
 0x684   : > { %v5011_v0 = vpop.f32.mrf.mxu1 }
 0x685   : > { %5100 = vmatpush3.xpose.msk.msra.mxu0 %vm1534_vm2, %v2725_v62  ;;  %v2973_v2 = vpop.f32.mrf.mxu0 }
 0x686   : > { %v2974_v4 = vadd.f32 %v4531_v63, %v2973_v2  ;;  %5109 = vmatprep.subr.mxu0 %v5330_v1  ;;  %v4538_v63 = vld [vmem:[%s6366_s7 + $0xa] ss:$0 sm:$0xff] }
 0x687   : > { %v5044_v5 = vpop.f32.mrf.mxu0 }
 0x688   : > { %5102 = vmatmul.mubr.msk.f32.vlgmr.msra.gmra.mxu0 %vm1534_vm2, %v2642_v3  ;;  %v4559_v3 = vld [vmem:[%s6366_s7 + $0xb] ss:$0 sm:$0xff] }
 0x689   : > { %5110 = vmatpush3.xpose.msk.msra.mxu0 %vm1534_vm2, %v2974_v4  ;;  %5111 = vmatprep.mubr.msk.f32.mxu0 %vm5331_vm0, %v5330_v1 }
 0x68a   : > { %5119 = vmatprep.subr.mxu0 %v5330_v1 }
 0x68d   : > { %v2890_v9 = vpop.f32.mrf.mxu1 }
 0x68e   : > { %v2891_v11 = vadd.f32 %v4524_v7, %v2890_v9  ;;  %v3139_v12 = vpop.f32.mrf.mxu0 }
 0x68f   : > { %v5033_v13 = vpop.f32.mrf.mxu1  ;;  %v3140_v21 = vadd.f32 %v4545_v18, %v3139_v12 }
 0x690   : > { %v5066_v14 = vpop.f32.mrf.mxu0  ;;  %5112 = vmatmul.mubr.msk.f32.vlgmr.msra.gmra.mxu0 %vm1534_vm2, %v2891_v11 }
 0x691   : > { %5121 = vmatprep.mubr.msk.f32.mxu0 %vm5331_vm0, %v5330_v1 }
 0x695   : > { %v6138_v15 = vpop.f32.mrf.mxu1 }
 0x696   : > { %v3057_v57 = vadd.f32 %v4538_v63, %v6138_v15  ;;  %v3967_v15 = vld [vmem:[%s6367_s8 + $0x18] sm:$0xff]  ;;  %v4576_v63 = vld [vmem:[%s6373_s14 + $0x1] ss:$0 sm:$0xff] }
 0x697   : > { %v5055_v16 = vpop.f32.mrf.mxu1 }
 0x698   : > { %v3966_v16 = vld [vmem:[%s6367_s8 + $0x10] sm:$0xff] }
 0x69b   : > { %v6151_v22 = vpop.f32.mrf.mxu0 }
 0x69c   : > { %v3306_v7 = vadd.f32 %v4559_v3, %v6151_v22 }
 0x69d   : > { %v3222_v17 = vpop.f32.mrf.mxu1  ;;  %v5088_v23 = vpop.f32.mrf.mxu0 }
 0x69e   : > { %v3223_v19 = vadd.f32 %v4552_v10, %v3222_v17  ;;  %v3965_v10 = vld [vmem:[%s6367_s8 + $0x8] sm:$0xff] }
 0x69f   : > { %v5077_v20 = vpop.f32.mrf.mxu1 }
 0x6a0   : > { %5120 = vmatpush3.xpose.msk.msra.mxu0 %vm1534_vm2, %v3223_v19 }
 0x6a1   : > { %5129 = vmatprep.subr.mxu0 %v5330_v1 }
 0x6a3   : > { %5122 = vmatmul.mubr.msk.f32.vlgmr.msra.gmra.mxu0 %vm1534_vm2, %v3140_v21  ;;  %v3964_v21 = vld [vmem:[%s6367_s8] sm:$0xff] }
 0x6a4   : > { %5137 = vmatprep.mubr.msk.f32.mxu0 %vm5331_vm0, %v5330_v1  ;;  %5130 = vmatpush3.msra.mxu0 %v3967_v15  ;;  %v4581_v15 = vld [vmem:[%s6372_s13] ss:$0 sm:$0xff] }
 0x6a5   : > { %5131 = vmatprep.subr.mxu0 %v5330_v1 }
 0x6a6   : > { %5132 = vmatpush3.msra.mxu0 %v3966_v16 }
 0x6a7   : > { %5133 = vmatprep.subr.mxu0 %v5330_v1 }
 0x6a8   : > { %5134 = vmatpush3.msra.mxu0 %v3965_v10 }
 0x6a9   : > { %5135 = vmatprep.subr.mxu0 %v5330_v1 }
 0x6aa   : > { %5136 = vmatpush3.msra.mxu0 %v3964_v21 }
 0x6ab   : > { %5151 = vmatprep.subr.mxu0 %v5330_v1 }
 0x733   : > { %v3381_v24 = vpop.f32.mrf.mxu1 }
 0x734   : > { %v3385_v25 = vsel %vm1534_vm2, %v3381_v24, -inf }
 0x735   : > { %3386 = vmax.xlane.f32.xlu0 %v3385_v25  ;;  %v5093_v26 = vpop.f32.mrf.mxu1 }
 0x748   : > { %v3541_v27 = vpop.f32.mrf.mxu0 }
 0x749   : > { %v3545_v28 = vsel %vm1534_vm2, %v3541_v27, -inf }
 0x74a   : > { %v5103_v29 = vpop.f32.mrf.mxu0  ;;  %3546 = vmax.xlane.f32.xlu0 %v3545_v28 }
 0x750   : > { %v3701_v30 = vpop.f32.mrf.mxu0 }
 0x751   : > { %v3705_v31 = vsel %vm1534_vm2, %v3701_v30, -inf }
 0x752   : > { %3706 = vmax.xlane.f32.xlu1 %v3705_v31  ;;  %v5113_v32 = vpop.f32.mrf.mxu0 }
 0x763   : > { %v3861_v33 = vpop.f32.mrf.mxu0 }
 0x764   : > { %v3865_v34 = vsel %vm1534_vm2, %v3861_v33, -inf }
 0x765   : > { %v5123_v35 = vpop.f32.mrf.mxu0  ;;  %3866 = vmax.xlane.f32.xlu0 %v3865_v34 }
 0x7be   : > { %v3387_v36 = vpop.xlane.xlu0 %3386 }
 0x7bf   : > { %v3388_v37 = vsub.f32 %v3381_v24, %v3387_v36 }
 0x7c1   : > { %v3389_v38 = vmul.f32 1.442695, %v3388_v37 }
 0x7c3   : > { %5248 = vpow2.f32 %v3389_v38  ;;  %v4085_v38 = vld [vmem:[%s6369_s10 + $0x18] sm:$0xff] }
 0x7d0   : > { %v5249_v39 = vpop.eup %5248 }
 0x7d1   : > { %v3391_v40 = vsel %vm1534_vm2, %v5249_v39, 0.0 }
 0x7d2   : > { %3392 = vadd.xlane.f32.xlu1 %v3391_v40  ;;  %v4082_v40 = vld [vmem:[%s6369_s10] sm:$0xff] }
 0x7d3   : > { %v3547_v41 = vpop.xlane.xlu0 %3546 }
 0x7d4   : > { %v3548_v42 = vsub.f32 %v3541_v27, %v3547_v41  ;;  %v4182_v41 = vld [vmem:[%s6371_s12 + $0x78] sm:$0xff] }
 0x7d6   : > { %v3549_v43 = vmul.f32 1.442695, %v3548_v42  ;;  %v4181_v42 = vld [vmem:[%s6371_s12 + $0x70] sm:$0xff] }
 0x7d8   : > { %5250 = vpow2.f32 %v3549_v43  ;;  %v4180_v43 = vld [vmem:[%s6371_s12 + $0x68] sm:$0xff] }
 0x7db   : > { %v3707_v44 = vpop.xlane.xlu1 %3706 }
 0x7dc   : > { %v3708_v45 = vsub.f32 %v3701_v30, %v3707_v44  ;;  %v4573_v30 = vld [vmem:[%s6368_s9] ss:$0 sm:$0xff] }
 0x7dd   : > { %v4179_v44 = vld [vmem:[%s6371_s12 + $0x60] sm:$0xff] }
 0x7de   : > { %v3709_v8 = vmul.f32 1.442695, %v3708_v45  ;;  %v4178_v45 = vld [vmem:[%s6371_s12 + $0x58] sm:$0xff] }
 0x7e0   : > { %5252 = vpow2.f32 %v3709_v8  ;;  %v4177_v8 = vld [vmem:[%s6371_s12 + $0x50] sm:$0xff] }
 0x7e5   : > { %v5251_v46 = vpop.eup %5250 }
 0x7e6   : > { %v3551_v47 = vsel %vm1534_vm2, %v5251_v46, 0.0 }
 0x7e7   : > { %3552 = vadd.xlane.f32.xlu0 %v3551_v47  ;;  %v4175_v47 = vld [vmem:[%s6371_s12 + $0x40] sm:$0xff] }
 0x7ed   : > { %v5253_v48 = vpop.eup %5252 }
 0x7ee   : > { %v3867_v49 = vpop.xlane.xlu0 %3866  ;;  %v3711_v51 = vsel %vm1534_vm2, %v5253_v48, 0.0 }
 0x7ef   : > { %v3868_v52 = vsub.f32 %v3861_v33, %v3867_v49  ;;  %3712 = vadd.xlane.f32.xlu1 %v3711_v51  ;;  %v4173_v49 = vld [vmem:[%s6371_s12 + $0x30] sm:$0xff]  ;;  %v4172_v51 = vld [vmem:[%s6371_s12 + $0x28] sm:$0xff] }
 0x7f1   : > { %v3869_v53 = vmul.f32 1.442695, %v3868_v52  ;;  %v4171_v52 = vld [vmem:[%s6371_s12 + $0x20] sm:$0xff] }
 0x7f3   : > { %5254 = vpow2.f32 %v3869_v53  ;;  %v4170_v53 = vld [vmem:[%s6371_s12 + $0x18] sm:$0xff] }
 0x800   : > { %v5255_v50 = vpop.eup %5254 }
 0x801   : > { %v3871_v54 = vsel %vm1534_vm2, %v5255_v50, 0.0 }
 0x802   : > { %3872 = vadd.xlane.f32.xlu0 %v3871_v54 }
 0x85b   : > { %v3393_v55 = vpop.xlane.xlu1 %3392 }
 0x85c   : > { %5256 = vrcp.f32 %v3393_v55 }
 0x869   : > { %v5257_v58 = vpop.eup %5256 }
 0x86a   : > { %v3395_v59 = vmul.f32 %v5257_v58, %v5249_v39  ;;  %v4084_v39 = vld [vmem:[%s6369_s10 + $0x10] sm:$0xff] }
 0x86c   : > { %5097 = vmatmul.mubr.msk.f32.vlgmr.msra.gmra.mxu1 %vm1534_vm2, %v3395_v59 }
 0x86d   : > { %5105 = vmatpush3.msra.mxu1 %v2808_v60  ;;  %5106 = vmatprep.mubr.msk.f32.mxu1 %vm5331_vm0, %v5330_v1 }
 0x86e   : > { %5114 = vmatprep.subr.mxu1 %v5330_v1 }
 0x870   : > { %v3553_v61 = vpop.xlane.xlu0 %3552 }
 0x871   : > { %5258 = vrcp.f32 %v3553_v61 }
 0x878   : > { %v3713_v62 = vpop.xlane.xlu1 %3712 }
 0x879   : > { %5260 = vrcp.f32 %v3713_v62 }
 0x87e   : > { %v5259_v0 = vpop.eup %5258 }
 0x87f   : > { %v3555_v2 = vmul.f32 %v5259_v0, %v5251_v46  ;;  %v4176_v46 = vld [vmem:[%s6371_s12 + $0x48] sm:$0xff] }
 0x881   : > { %5107 = vmatmul.mubr.msk.f32.vlgmr.msra.gmra.mxu1 %vm1534_vm2, %v3555_v2  ;;  %v4578_v2 = vld [vmem:[%s6374_s15 + $0x1] ss:$0 sm:$0xff] }
 0x882   : > { %5115 = vmatpush3.msra.mxu1 %v3057_v57  ;;  %5116 = vmatprep.mubr.msk.f32.mxu1 %vm5331_vm0, %v5330_v1 }
 0x883   : > { %5124 = vmatprep.subr.mxu1 %v5330_v1 }
 0x886   : > { %v5261_v4 = vpop.eup %5260 }
 0x887   : > { %v3715_v5 = vmul.f32 %v5261_v4, %v5253_v48  ;;  %v4174_v48 = vld [vmem:[%s6371_s12 + $0x38] sm:$0xff]  ;;  %v4169_v4 = vld [vmem:[%s6371_s12 + $0x10] sm:$0xff] }
 0x889   : > { %5117 = vmatmul.mubr.msk.f32.vlgmr.msra.gmra.mxu1 %vm1534_vm2, %v3715_v5  ;;  %v4168_v5 = vld [vmem:[%s6371_s12 + $0x8] sm:$0xff] }
 0x88a   : > { %5125 = vmatpush3.msra.mxu1 %v3306_v7  ;;  %5126 = vmatprep.mubr.msk.f32.mxu1 %vm5331_vm0, %v5330_v1  ;;  %v4167_v7 = vld [vmem:[%s6371_s12] sm:$0xff] }
 0x88b   : > { %v3873_v9 = vpop.xlane.xlu0 %3872  ;;  %5140 = vmatprep.subr.mxu1 %v5330_v1 }
 0x88c   : > { %5262 = vrcp.f32 %v3873_v9  ;;  %v4579_v9 = vld [vmem:[%s6370_s11] ss:$0 sm:$0xff] }
 0x899   : > { %v5263_v11 = vpop.eup %5262 }
 0x89a   : > { %v3875_v12 = vmul.f32 %v5263_v11, %v5255_v50 }
 0x89c   : > { %5127 = vmatmul.mubr.msk.f32.vlgmr.msra.gmra.mxu1 %vm1534_vm2, %v3875_v12 }
 0x89d   : > { %5148 = vmatprep.mubr.msk.f32.mxu1 %vm5331_vm0, %v5330_v1  ;;  %5141 = vmatpush3.msra.mxu1 %v4085_v38 }
 0x89e   : > { %5142 = vmatprep.subr.mxu1 %v5330_v1 }
 0x89f   : > { %5143 = vmatpush3.msra.mxu1 %v4084_v39 }
 0x8a0   : > { %5144 = vmatprep.subr.mxu1 %v5330_v1 }
 0x92c   : > { %v3465_v13 = vpop.f32.mrf.mxu1 }
 0x92e   : > { %v5098_v14 = vpop.f32.mrf.mxu1 }
 0x941   : > { %v3625_v17 = vpop.f32.mrf.mxu1 }
 0x942   : > { %3950 = vrot.lane.b32.xlu1 %v3625_v17, %s6397_s24 }
 0x943   : > { %v5108_v18 = vpop.f32.mrf.mxu1 }
 0x949   : > { %v3785_v19 = vpop.f32.mrf.mxu1 }
 0x94a   : > { %3954 = vrot.lane.b32.xlu0 %v3785_v19, %s6398_s30  ;;  %s4587_s30 = sshll.u32 %s5442_s25, 7  ;;  %s5274_s25 = scalar_lea.vmem %s5273_s21, 256 }
 0x94b   : > { %v5118_v20 = vpop.f32.mrf.mxu1  ;;  %s4307_s19 = scalar_lea.hbm %s6375_s16, %s4587_s30  ;;  %p5276_p1 = scmp.lt.s32.totalorder %s5274_s25, %s5268_s23 }
 0x94d   : > { %p5277_p2 = por %p5276_p1, %p5275_p0 }
 0x94f   : > { %p5278_p3 = pnand %p5277_p2, %p5271_p13 }
 0x95c   : > { %v3945_v22 = vpop.f32.mrf.mxu1 }
 0x95d   : > { %3958 = vrot.lane.b32.xlu1 %v3945_v22, %s6399_s28 }
 0x95e   : > { %v5128_v23 = vpop.f32.mrf.mxu1 }
 0x9b4   : > { %v3951_v24 = vpop.permute.xlu1 %3950 }
 0x9b5   : > { %v3961_v26 = vsel %vm1534_vm2, %v3465_v13, %v3951_v24 }
 0x9bc   : > { %v3955_v25 = vpop.permute.xlu0 %3954 }
 0x9bd   : > { %v3962_v27 = vsel %vm2188_vm3, %v3961_v26, %v3955_v25 }
 0x9cf   : > { %v3959_v28 = vpop.permute.xlu1 %3958 }
 0x9d0   : > { %v3963_v29 = vsel %vm2190_vm4, %v3962_v27, %v3959_v28 }
 0x9d1   : > { %5138 = vmatmul.mubr.msk.f32.vlgmr.msra.gmra.mxu0 %vm547_vm1, %v3963_v29 }
 0x9d2   : > { %5183 = vmatprep.mubr.msk.f32.mxu0 %vm5331_vm0, %v5330_v1  ;;  %5152 = vmatpush3.msra.mxu0 %v4182_v41 }
 0x9d3   : > { %5153 = vmatprep.subr.mxu0 %v5330_v1 }
 0x9d4   : > { %5154 = vmatpush3.msra.mxu0 %v4181_v42 }
 0x9d5   : > { %5155 = vmatprep.subr.mxu0 %v5330_v1 }
 0x9d6   : > { %5156 = vmatpush3.msra.mxu0 %v4180_v43 }
 0x9d7   : > { %5157 = vmatprep.subr.mxu0 %v5330_v1 }
 0x9d8   : > { %5158 = vmatpush3.msra.mxu0 %v4179_v44 }
 0x9d9   : > { %5159 = vmatprep.subr.mxu0 %v5330_v1 }
 0x9da   : > { %5160 = vmatpush3.msra.mxu0 %v4178_v45 }
 0x9db   : > { %5161 = vmatprep.subr.mxu0 %v5330_v1 }
 0x9dc   : > { %5162 = vmatpush3.msra.mxu0 %v4177_v8 }
 0x9dd   : > { %5163 = vmatprep.subr.mxu0 %v5330_v1 }
 0x9de   : > { %5164 = vmatpush3.msra.mxu0 %v4176_v46 }
 0x9df   : > { %5165 = vmatprep.subr.mxu0 %v5330_v1 }
 0x9e0   : > { %5166 = vmatpush3.msra.mxu0 %v4175_v47 }
 0x9e1   : > { %5167 = vmatprep.subr.mxu0 %v5330_v1 }
 0x9e2   : > { %5168 = vmatpush3.msra.mxu0 %v4174_v48 }
 0x9e3   : > { %5169 = vmatprep.subr.mxu0 %v5330_v1 }
 0x9e4   : > { %5170 = vmatpush3.msra.mxu0 %v4173_v49 }
 0x9e5   : > { %5171 = vmatprep.subr.mxu0 %v5330_v1 }
 0x9e6   : > { %5172 = vmatpush3.msra.mxu0 %v4172_v51 }
 0x9e7   : > { %5173 = vmatprep.subr.mxu0 %v5330_v1 }
 0x9e8   : > { %5174 = vmatpush3.msra.mxu0 %v4171_v52 }
 0x9e9   : > { %5175 = vmatprep.subr.mxu0 %v5330_v1 }
 0x9ea   : > { %5176 = vmatpush3.msra.mxu0 %v4170_v53 }
 0x9eb   : > { %5177 = vmatprep.subr.mxu0 %v5330_v1 }
 0x9ec   : > { %5178 = vmatpush3.msra.mxu0 %v4169_v4 }
 0x9ed   : > { %5179 = vmatprep.subr.mxu0 %v5330_v1 }
 0x9ee   : > { %5180 = vmatpush3.msra.mxu0 %v4168_v5 }
 0x9ef   : > { %5181 = vmatprep.subr.mxu0 %v5330_v1 }
 0x9f0   : > { %5182 = vmatpush3.msra.mxu0 %v4167_v7 }
 0xa91   : > { %v4044_v31 = vpop.f32.mrf.mxu0 }
 0xa92   : > { %v4045_v32 = vadd.f32 %v4573_v30, %v4044_v31  ;;  %v4583_v30 = vld [vmem:[%s6373_s14 + $0x2] ss:$0 sm:$0xff] }
 0xa93   : > { %v5139_v33 = vpop.f32.mrf.mxu0 }
 0xa94   : > { %v6217_v34 = vadd.f32 %v4045_v32, %v5909_v6  ;;  %v4083_v6 = vld [vmem:[%s6369_s10 + $0x8] sm:$0xff]  ;;  %v4585_v32 = vld [vmem:[%s6374_s15 + $0x2] ss:$0 sm:$0xff] }
 0xa95   : > { %5145 = vmatpush3.msra.mxu1 %v4083_v6 }
 0xa96   : > { %v4049_v35 = vsel %vm547_vm1, %v6217_v34, 0.0  ;;  %v4053_v36 = vmul.f32 %v6217_v34, %v6217_v34  ;;  %5146 = vmatprep.subr.mxu1 %v5330_v1 }
 0xa97   : > { %4050 = vadd.xlane.f32.xlu1 %v4049_v35  ;;  %5147 = vmatpush3.msra.mxu1 %v4082_v40 }
 0xa98   : > { %v4054_v37 = vsel %vm547_vm1, %v4053_v36, 0.0 }
 0xa99   : > { %4055 = vadd.xlane.f32.xlu0 %v4054_v37 }
 0xb20   : > { %v4051_v50 = vpop.xlane.xlu1 %4050 }
 0xb21   : > { %v4052_v54 = vmul.f32 0.03125, %v4051_v50 }
 0xb22   : > { %v4056_v55 = vpop.xlane.xlu0 %4055 }
 0xb23   : > { %v4058_v56 = vmul.f32 %v4052_v54, %v4052_v54  ;;  %v4057_v58 = vmul.f32 0.03125, %v4056_v55  ;;  %v4060_v61 = vsub.f32 %v6217_v34, %v4052_v54 }
 0xb25   : > { %v4059_v59 = vsub.f32 %v4057_v58, %v4058_v56 }
 0xb27   : > { %v4061_v60 = vadd.f32 1e-05, %v4059_v59 }
 0xb29   : > { %5264 = vrsqrt.f32 %v4061_v60 }
 0xb36   : > { %v5265_v62 = vpop.eup %5264 }
 0xb37   : > { %v4063_v0 = vmul.f32 %v5265_v62, %v4060_v61 }
 0xb39   : > { %v4072_v57 = vmul.f32 %v4576_v63, %v4063_v0 }
 0xb3b   : > { %v4081_v3 = vadd.f32 %v4578_v2, %v4072_v57 }
 0xb3d   : > { %5149 = vmatmul.mubr.msk.f32.vlgmr.msra.gmra.mxu1 %vm547_vm1, %v4081_v3 }
 0xbfd   : > { %v4162_v11 = vpop.f32.mrf.mxu1 }
 0xbfe   : > { %v4163_v12 = vadd.f32 %v4579_v9, %v4162_v11 }
 0xbff   : > { %v5150_v13 = vpop.f32.mrf.mxu1 }
 0xc00   : > { %v4166_v14 = vmax.f32 %v4163_v12, 0.0 }
 0xc02   : > { %5184 = vmatmul.mubr.f32.vlgmr.msra.gmra.mxu0 %v4166_v14 }
 0xcc2   : > { %v4256_v16 = vpop.f32.mrf.mxu0 }
 0xcc3   : > { %v4257_v10 = vadd.f32 %v4581_v15, %v4256_v16 }
 0xcc4   : > { %v5185_v17 = vpop.f32.mrf.mxu0 }
 0xcc5   : > { %v4260_v18 = vadd.f32 %v4257_v10, %v4081_v3 }
 0xcc7   : > { %v4261_v1 = vsel %vm547_vm1, %v4260_v18, 0.0  ;;  %v4265_v19 = vmul.f32 %v4260_v18, %v4260_v18 }
 0xcc8   : > { %4262 = vadd.xlane.f32.xlu0 %v4261_v1 }
 0xcc9   : > { %v4266_v20 = vsel %vm547_vm1, %v4265_v19, 0.0 }
 0xcca   : > { %4267 = vadd.xlane.f32.xlu1 %v4266_v20 }
 0xd51   : > { %v4263_v21 = vpop.xlane.xlu0 %4262 }
 0xd52   : > { %v4264_v22 = vmul.f32 0.03125, %v4263_v21 }
 0xd53   : > { %v4268_v23 = vpop.xlane.xlu1 %4267 }
 0xd54   : > { %v4270_v24 = vmul.f32 %v4264_v22, %v4264_v22  ;;  %v4269_v25 = vmul.f32 0.03125, %v4268_v23  ;;  %v4272_v28 = vsub.f32 %v4260_v18, %v4264_v22 }
 0xd56   : > { %v4271_v26 = vsub.f32 %v4269_v25, %v4270_v24 }
 0xd58   : > { %v4273_v27 = vadd.f32 1e-05, %v4271_v26 }
 0xd5a   : > { %5266 = vrsqrt.f32 %v4273_v27 }
 0xd67   : > { %v5267_v29 = vpop.eup %5266 }
 0xd68   : > { %v4275_v31 = vmul.f32 %v5267_v29, %v4272_v28 }
 0xd6a   : > { %v4284_v33 = vmul.f32 %v4583_v30, %v4275_v31 }
 0xd6c   : > { %v4293_v34 = vadd.f32 %v4585_v32, %v4284_v33 }
 0xd6e   : > { %4294 = vst.msk [vmem:[%s525_s29] sm:$0xff] %vm547_vm1, %v4293_v34 }
 0xd6f   : > { %5281 = shalt.err (!%p5278_p3)
}
 0xd70   : > { %s5282_s20 = scalar_lea.hbm %s4307_s19, 128  ;;  %s5286_s30 = scalar_lea.hbm %s6375_s16, 256 }
 0xd71   : > { %p5283_p4 = scmp.ne.s32.totalorder %s4307_s19, %s5282_s20  ;;  %p5287_p9 = scmp.lt.s32.totalorder %s4307_s19, %s6375_s16 }
 0xd72   : > { %p5288_p10 = scmp.lt.s32.totalorder %s5286_s30, %s5282_s20 }
 0xd73   : > { %p5284_p7 = pnand %p5283_p4, %p5459_p5 }
 0xd74   : > { %p5289_p11 = por %p5288_p10, %p5287_p9 }
 0xd75   : > { %p5285_p8 = pneg %p5284_p7 }
 0xd77   : > { %p5290_p12 = pnand %p5289_p11, %p5285_p8 }
 0xd79   : > { %5293 = shalt.err (!%p5290_p12)
}
 0xd7a   : > { %5186 = dma.vmem_to_hbm [thread:$0]  (%p5459_p5), %s4310_s18, 128, %s4307_s19, %s4296_s1  }
 0xd7b PF: > { %s6400_s26 = sld [smem:[#allocation7_spill]] }
 0xd7c   : > { %s6401_s23 = sld [smem:[#allocation5_spill]] }
 0xd81   : > { %p5192_p13 = scmp.ge.s32.totalorder %s6400_s26, 2 }
 0xd82   : > { %s4321_s21 = sand.u32 1, %s6401_s23  }
 0xd83   : > { %p5189_p0 = pnand %p5192_p13, %p5463_p6  ;;  %s4322_s25 = scalar_lea.sflag [#allocation3], %s4321_s21 }
 0xd85   : > { %p5190_p1 = pneg %p5189_p0 }
 0xd87   : > { %5311 = dma.done.wait (%p5190_p1), %s4322_s25, 128  }
 0xd88   : > { %5313 = vsyncadd (%p5190_p1), %s4322_s25, 4294967168  ;;  %s6403_s24 = sld [smem:[#allocation8_spill]]  ;;  %s6406_s21 = smov %s5320_s22 }
 0xd89   : > { %s6404_s20 = sld [smem:[#allocation6_spill]] }
 0xd8a   : > { %s6405_s23 = sld [smem:[#allocation9_spill]] }
 0xd8e   : > { %p26_p2 = scmp.ge.s32.totalorder %s6403_s24, 4  }
 0xd8f   : > { %s6407_s22 = smov %s6404_s20 }
 0xd90   :  { %28 = sbr.rel (!%p26_p2) target bundleno = 6 (0x6), region = 170 }
 0xd95   :  { %4327 = vsyncpa [#allocation3], 1 }
 0xd96   :  { %4329 = vsyncpa [#allocation3 + $0x1], 1 }

</bundles_post_ra>
